<compile_context>
chip_gen: v7x
topology: tpu7x:2x2x1
jax: 0.10.0
libtpu: 0.0.40
codegen_flags: <defaults>
</compile_context>

<pallas_src>
import jax
import jax.numpy as jnp
from jax.experimental import pallas as pl
from jax.experimental.pallas import tpu as pltpu

INPUT_SIZE = 33                  # F  (d_model = F - 1)
D_MODEL = INPUT_SIZE - 1         # 32
NHEAD = 2
HEAD_DIM = D_MODEL // NHEAD      # 16
DFF = 64                         # dim_feedforward (small synthetic choice)
NLAYERS = 3
NEG = -1e30                      # additive mask value (acts like -inf), keep f32
LN_EPS = 1e-5


def _layernorm(v, w, b):
    mu = jnp.mean(v, axis=-1, keepdims=True)
    var = jnp.mean((v - mu) ** 2, axis=-1, keepdims=True)
    return (v - mu) * jax.lax.rsqrt(var + LN_EPS) * w + b


def etcformer_kernel(x_ref,                          # (BT*S, d)   f32
                     prog_ref,                       # (BT*S, 1)   f32
                     len_ref,                        # (BT, 1, 1)  int32
                     qkvw_ref, qkvb_ref,             # (L, d, 3d), (L, 3d)   q pre-scaled
                     ow_ref,                         # (L, d, d)
                     vec_ref,                        # (6, L, d): opb, ln1w, ln1b, lin2b, ln2w, ln2b
                     w1_ref, b1_ref, w2_ref,         # (L, d, DFF), (L, DFF), (L, DFF, d)
                     hwd_ref, hwp_ref, hb_ref,       # (d, 2), (1, 2), (1, 2)
                     out_ref):                       # (BT*S, 2)
    M, d = x_ref.shape
    BT = len_ref.shape[0]
    S = M // BT
    E = HEAD_DIM

    x2 = x_ref[...]                                  # (M, d), rows already flattened
    prog = prog_ref[...]                             # (M, 1)

    # ---- additive causal + key-padding mask, built in-kernel from lengths ----
    row = jax.lax.broadcasted_iota(jnp.int32, (S, S), 0)
    col = jax.lax.broadcasted_iota(jnp.int32, (S, S), 1)
    causal = (col <= row)[None, :, :]                # (1, S, S)
    lens = len_ref[...]                              # (BT, 1, 1) int32, vectorized load
    keep = causal & (col[None, :, :] < lens)         # (BT, S, S)
    addmask = jnp.where(keep, 0.0, NEG)              # f32 additive mask

    for l in range(NLAYERS):                         # static layer loop
        # ---- fused QKV projection: single MXU pass, q already scaled ----
        qkv = (jnp.dot(x2, qkvw_ref[l], preferred_element_type=jnp.float32)
               + qkvb_ref[l])                        # (M, 3d) = [q_h0|q_h1|k_h0|k_h1|v_h0|v_h1]

        heads = []
        for h in range(NHEAD):                       # static head loop (tiny lane slices)
            q = qkv[:, h * E:(h + 1) * E].reshape(BT, S, E)
            k = qkv[:, d + h * E: d + (h + 1) * E].reshape(BT, S, E)
            v = qkv[:, 2 * d + h * E: 2 * d + (h + 1) * E].reshape(BT, S, E)
            sc = jnp.einsum('bqe,bke->bqk', q, k,
                            preferred_element_type=jnp.float32) + addmask
            sc = sc - jnp.max(sc, axis=-1, keepdims=True)
            p = jnp.exp(sc)
            # exact normalization kept (pl.reciprocal(approx=True) considered but
            # rejected to preserve 1e-4 parity with the f32 reference)
            p = p * (1.0 / jnp.sum(p, axis=-1, keepdims=True))
            ah = jnp.einsum('bqk,bke->bqe', p, v,
                            preferred_element_type=jnp.float32)
            heads.append(ah.reshape(M, E))

        # lane-concat heads -> single (M,32) @ (32,32) output projection
        a = jnp.concatenate(heads, axis=-1)                          # (M, d)
        attn = (jnp.dot(a, ow_ref[l], preferred_element_type=jnp.float32)
                + vec_ref[0, l])
        # dropout is identity in eval mode
        x2 = _layernorm(x2 + attn, vec_ref[1, l], vec_ref[2, l])

        # ---- feed forward (ReLU) ----
        h1 = jnp.dot(x2, w1_ref[l], preferred_element_type=jnp.float32) + b1_ref[l]
        h1 = jnp.maximum(h1, 0.0)
        h2 = jnp.dot(h1, w2_ref[l], preferred_element_type=jnp.float32) + vec_ref[3, l]
        x2 = _layernorm(x2 + h2, vec_ref[4, l], vec_ref[5, l])

    # ---- progress head, split form (no 33-wide concat) ----
    logits = (jnp.dot(x2, hwd_ref[...], preferred_element_type=jnp.float32)
              + prog * hwp_ref[...] + hb_ref[...])                   # (M, 2)
    # Output last-dim is 2 (< 128 lanes) -> masked stores; output volume is tiny,
    # so no lane-dense re-layout is worth it at these shapes.
    out_ref[...] = jax.nn.sigmoid(logits)


def _default_batch_tile(B):
    """Whole batch per grid step on v5e/v6e (1 TC); split in two on v7x (2 TCs)."""
    try:
        kind = jax.devices()[0].device_kind.lower()
    except Exception:
        kind = ""
    if "v7" in kind and B >= 2 and B % 2 == 0:
        return B // 2
    return B


def etcformer_forward(x, lengths, params, *, batch_tile=None, vmem_limit_bytes=None):
    """x: (B, S, F) f32; lengths: (B,) int.  batch_tile: batch elems per grid step
    (device-aware default).  vmem_limit_bytes: raise only if large BT*S^2
    attention temporaries exceed the default scoped VMEM limit."""
    B, S, F = x.shape
    assert F == INPUT_SIZE
    d, E, L = D_MODEL, HEAD_DIM, NLAYERS

    # Pad S to a sublane multiple so (M, .) <-> (BT, S, .) reshapes stay sublane-only.
    S_p = ((S + 7) // 8) * 8
    if S_p != S:
        x = jnp.pad(x, ((0, 0), (0, S_p - S), (0, 0)))

    BT = _default_batch_tile(B) if batch_tile is None else min(batch_tile, B)
    assert B % BT == 0
    nt = B // BT

    # ---- trace-time input plumbing: feature split + row flatten (free in XLA) ----
    x = x.astype(jnp.float32)
    x_main = x[:, :, :d].reshape(B * S_p, d)                         # (B*S, d)
    prog = x[:, :, d:d + 1].reshape(B * S_p, 1)                      # (B*S, 1)
    lens3 = lengths.astype(jnp.int32).reshape(B, 1, 1)               # (B, 1, 1)

    # ---- trace-time weight re-layout (transposes, q pre-scaling, blob packing) ----
    scale = 1.0 / jnp.sqrt(jnp.float32(E))
    qscale = jnp.concatenate([jnp.full((d,), scale, jnp.float32),
                              jnp.ones((2 * d,), jnp.float32)])      # scale q block only
    qkv_w = jnp.transpose(params["ipw"], (0, 2, 1)) * qscale         # (L, d, 3d)
    qkv_b = params["ipb"] * qscale                                   # (L, 3d)
    ow_t = jnp.transpose(params["opw"], (0, 2, 1))                   # (L, d, d)
    vecs = jnp.stack([params["opb"], params["ln1w"], params["ln1b"],
                      params["lin2b"], params["ln2w"], params["ln2b"]], axis=0)  # (6, L, d)
    w1_t = jnp.transpose(params["lin1w"], (0, 2, 1))                 # (L, d, DFF)
    b1 = params["lin1b"]                                             # (L, DFF)
    w2_t = jnp.transpose(params["lin2w"], (0, 2, 1))                 # (L, DFF, d)
    hw_t = params["head_w"].T                                        # (F, 2)
    hwd, hwp = hw_t[:d, :], hw_t[d:, :]                              # (d, 2), (1, 2)
    hb = params["head_b"]                                            # (1, 2)

    weights = [qkv_w, qkv_b, ow_t, vecs, w1_t, b1, w2_t, hwd, hwp, hb]

    def full_spec(a):                                # constant index_map -> DMA'd once
        nd = a.ndim
        return pl.BlockSpec(a.shape, lambda i, _nd=nd: (0,) * _nd)

    in_specs = ([pl.BlockSpec((BT * S_p, d), lambda i: (i, 0)),
                 pl.BlockSpec((BT * S_p, 1), lambda i: (i, 0)),
                 pl.BlockSpec((BT, 1, 1), lambda i: (i, 0, 0))]
                + [full_spec(w) for w in weights])

    cp = dict(dimension_semantics=("parallel",))
    if vmem_limit_bytes is not None:
        cp["vmem_limit_bytes"] = vmem_limit_bytes

    out = pl.pallas_call(
        etcformer_kernel,
        out_shape=jax.ShapeDtypeStruct((B * S_p, 2), jnp.float32),
        grid=(nt,),
        in_specs=in_specs,
        out_specs=pl.BlockSpec((BT * S_p, 2), lambda i: (i, 0)),
        compiler_params=pltpu.CompilerParams(**cp),
    )(x_main, prog, lens3, *weights)
    return out.reshape(B, S_p, 2)[:, :S, :]


# ---------------- pure-JAX reference (same math, no Pallas) -----------------
def reference_forward(x, lengths, params):
    B, S, F = x.shape
    rows = jnp.arange(S)[:, None]
    cols = jnp.arange(S)[None, :]
    keep = (cols <= rows)[None, :, :] & (cols[None, :, :] < lengths[:, None, None])
    mask = jnp.where(keep, 0.0, NEG).astype(jnp.float32)             # (B, S, S)
    h = x[:, :, :D_MODEL]
    prog = x[:, :, D_MODEL:D_MODEL + 1]
    scale = 1.0 / jnp.sqrt(jnp.float32(HEAD_DIM))
    for l in range(NLAYERS):
        qkv = jnp.einsum("bsd,ed->bse", h, params["ipw"][l]) + params["ipb"][l]
        q, k, v = jnp.split(qkv, 3, axis=-1)

        def split_heads(t):
            return t.reshape(B, S, NHEAD, HEAD_DIM).transpose(0, 2, 1, 3)
        qh, kh, vh = split_heads(q) * scale, split_heads(k), split_heads(v)
        sc = jnp.einsum("bhqe,bhke->bhqk", qh, kh) + mask[:, None, :, :]
        p = jax.nn.softmax(sc, axis=-1)
        a = jnp.einsum("bhqk,bhke->bhqe", p, vh)
        a = a.transpose(0, 2, 1, 3).reshape(B, S, D_MODEL)
        a = jnp.einsum("bsd,ed->bse", a, params["opw"][l]) + params["opb"][l]
        h = _layernorm(h + a, params["ln1w"][l], params["ln1b"][l])
        f1 = jax.nn.relu(jnp.einsum("bsd,fd->bsf", h, params["lin1w"][l]) + params["lin1b"][l])
        f2 = jnp.einsum("bsf,df->bsd", f1, params["lin2w"][l]) + params["lin2b"][l]
        h = _layernorm(h + f2, params["ln2w"][l], params["ln2b"][l])
    s = jnp.concatenate([h, prog], axis=-1)
    logits = jnp.einsum("bsf,of->bso", s, params["head_w"]) + params["head_b"][0]
    return jax.nn.sigmoid(logits)


def init_params(key):
    d, f, dff, L = D_MODEL, INPUT_SIZE, DFF, NLAYERS
    ks = jax.random.split(key, 8)
    p = {
        "ipw":   0.05 * jax.random.normal(ks[0], (L, 3 * d, d), jnp.float32),
        "ipb":   0.02 * jax.random.normal(ks[1], (L, 3 * d), jnp.float32),
        "opw":   0.05 * jax.random.normal(ks[2], (L, d, d), jnp.float32),
        "opb":   0.02 * jax.random.normal(ks[3], (L, d), jnp.float32),
        "ln1w":  jnp.ones((L, d), jnp.float32),
        "ln1b":  jnp.zeros((L, d), jnp.float32),
        "lin1w": 0.05 * jax.random.normal(ks[4], (L, dff, d), jnp.float32),
        "lin1b": 0.02 * jax.random.normal(ks[5], (L, dff), jnp.float32),
        "lin2w": 0.05 * jax.random.normal(ks[6], (L, d, dff), jnp.float32),
        "lin2b": jnp.zeros((L, d), jnp.float32),
        "ln2w":  jnp.ones((L, d), jnp.float32),
        "ln2b":  jnp.zeros((L, d), jnp.float32),
        "head_w": 0.05 * jax.random.normal(ks[7], (2, f), jnp.float32),
        "head_b": jnp.zeros((1, 2), jnp.float32),
    }
    return p


if __name__ == "__main__":
    B, S = 2, 8
    key = jax.random.PRNGKey(0)
    kx, kp = jax.random.split(key)
    x = jax.random.normal(kx, (B, S, INPUT_SIZE), jnp.float32)
    lengths = jnp.array([8, 5], dtype=jnp.int32)   # padded sequence lengths
    params = init_params(kp)

    out = etcformer_forward(x, lengths, params)    # device-aware batch tiling
    out = jax.block_until_ready(out)

    ref = jax.block_until_ready(reference_forward(x, lengths, params))
    assert out.shape == (B, S, 2)
    assert jnp.allclose(out, ref, rtol=1e-4, atol=1e-4), (
        f"max abs diff {jnp.max(jnp.abs(out - ref))}")
    print("KERNEL_OK")
</pallas_src>

<mosaic_0001>
module attributes {stable_mosaic.version = 11 : i64} {
  func.func @etcformer_kernel(%arg0: i32, %arg1: memref<16x32xf32, #tpu.memory_space<vmem>>, %arg2: memref<16x1xf32, #tpu.memory_space<vmem>>, %arg3: memref<2x1x1xi32, #tpu.memory_space<vmem>>, %arg4: memref<3x32x96xf32, #tpu.memory_space<vmem>>, %arg5: memref<3x96xf32, #tpu.memory_space<vmem>>, %arg6: memref<3x32x32xf32, #tpu.memory_space<vmem>>, %arg7: memref<6x3x32xf32, #tpu.memory_space<vmem>>, %arg8: memref<3x32x64xf32, #tpu.memory_space<vmem>>, %arg9: memref<3x64xf32, #tpu.memory_space<vmem>>, %arg10: memref<3x64x32xf32, #tpu.memory_space<vmem>>, %arg11: memref<32x2xf32, #tpu.memory_space<vmem>>, %arg12: memref<1x2xf32, #tpu.memory_space<vmem>>, %arg13: memref<1x2xf32, #tpu.memory_space<vmem>>, %arg14: memref<16x2xf32, #tpu.memory_space<vmem>>) attributes {dimension_semantics = [#tpu.dimension_semantics<parallel>], iteration_bounds = array<i64: 1>, scalar_prefetch = 0 : i64, scratch_operands = 0 : i64, tpu.core_type = #tpu.core_type<tc>, window_params = [{transform_indices = @transform_0, window_bounds = array<i64: 16, 32>}, {transform_indices = @transform_1, window_bounds = array<i64: 16, 1>}, {transform_indices = @transform_2, window_bounds = array<i64: 2, 1, 1>}, {pipeline_mode = #tpu.pipeline_mode<synchronous>, transform_indices = @transform_3, window_bounds = array<i64: 3, 32, 96>}, {pipeline_mode = #tpu.pipeline_mode<synchronous>, transform_indices = @transform_4, window_bounds = array<i64: 3, 96>}, {pipeline_mode = #tpu.pipeline_mode<synchronous>, transform_indices = @transform_5, window_bounds = array<i64: 3, 32, 32>}, {pipeline_mode = #tpu.pipeline_mode<synchronous>, transform_indices = @transform_6, window_bounds = array<i64: 6, 3, 32>}, {pipeline_mode = #tpu.pipeline_mode<synchronous>, transform_indices = @transform_7, window_bounds = array<i64: 3, 32, 64>}, {pipeline_mode = #tpu.pipeline_mode<synchronous>, transform_indices = @transform_8, window_bounds = array<i64: 3, 64>}, {pipeline_mode = #tpu.pipeline_mode<synchronous>, transform_indices = @transform_9, window_bounds = array<i64: 3, 64, 32>}, {pipeline_mode = #tpu.pipeline_mode<synchronous>, transform_indices = @transform_10, window_bounds = array<i64: 32, 2>}, {pipeline_mode = #tpu.pipeline_mode<synchronous>, transform_indices = @transform_11, window_bounds = array<i64: 1, 2>}, {pipeline_mode = #tpu.pipeline_mode<synchronous>, transform_indices = @transform_12, window_bounds = array<i64: 1, 2>}, {transform_indices = @transform_13, window_bounds = array<i64: 16, 2>}]} {
    %c0 = arith.constant 0 : index
    %c0_0 = arith.constant 0 : index
    %0 = vector.load %arg1[%c0, %c0_0] : memref<16x32xf32, #tpu.memory_space<vmem>>, vector<16x32xf32>
    %c0_1 = arith.constant 0 : index
    %c0_2 = arith.constant 0 : index
    %1 = vector.load %arg2[%c0_1, %c0_2] : memref<16x1xf32, #tpu.memory_space<vmem>>, vector<16x1xf32>
    %2 = tpu.iota {dimensions = array<i32: 0>} : vector<8x8xi32>
    %3 = tpu.iota {dimensions = array<i32: 1>} : vector<8x8xi32>
    %4 = arith.cmpi sle, %3, %2 : vector<8x8xi32>
    %5 = vector.shape_cast %4 : vector<8x8xi1> to vector<1x8x8xi1>
    %c0_3 = arith.constant 0 : index
    %c0_4 = arith.constant 0 : index
    %c0_5 = arith.constant 0 : index
    %6 = vector.load %arg3[%c0_3, %c0_4, %c0_5] : memref<2x1x1xi32, #tpu.memory_space<vmem>>, vector<2x1x1xi32>
    %7 = vector.shape_cast %3 : vector<8x8xi32> to vector<1x8x8xi32>
    %8 = vector.broadcast %7 : vector<1x8x8xi32> to vector<2x8x8xi32>
    %9 = vector.broadcast %6 : vector<2x1x1xi32> to vector<2x8x8xi32>
    %10 = arith.cmpi slt, %8, %9 : vector<2x8x8xi32>
    %11 = vector.broadcast %5 : vector<1x8x8xi1> to vector<2x8x8xi1>
    %12 = arith.andi %11, %10 : vector<2x8x8xi1>
    %cst = arith.constant 0.000000e+00 : f32
    %cst_6 = arith.constant -1.000000e+30 : f32
    %13 = vector.broadcast %cst : f32 to vector<2x8x8xf32>
    %14 = vector.broadcast %cst_6 : f32 to vector<2x8x8xf32>
    %15 = arith.select %12, %13, %14 : vector<2x8x8xi1>, vector<2x8x8xf32>
    %c0_7 = arith.constant 0 : index
    %c0_8 = arith.constant 0 : index
    %c0_9 = arith.constant 0 : index
    %16 = vector.load %arg4[%c0_7, %c0_8, %c0_9] : memref<3x32x96xf32, #tpu.memory_space<vmem>>, vector<1x32x96xf32>
    %17 = vector.shape_cast %16 : vector<1x32x96xf32> to vector<32x96xf32>
    %cst_10 = arith.constant dense<0.000000e+00> : vector<16x96xf32>
    %18 = tpu.matmul %0, %17, %cst_10 {dimension_numbers = #tpu.dot_dimension_numbers<[1], [0], [0], [1], [0, 0, 1, 1], [], []>} : vector<16x32xf32>, vector<32x96xf32>, vector<16x96xf32> -> vector<16x96xf32>
    %c0_11 = arith.constant 0 : index
    %c0_12 = arith.constant 0 : index
    %19 = vector.load %arg5[%c0_11, %c0_12] : memref<3x96xf32, #tpu.memory_space<vmem>>, vector<1x96xf32>
    %20 = vector.shape_cast %19 : vector<1x96xf32> to vector<96xf32>
    %21 = vector.shape_cast %20 : vector<96xf32> to vector<1x96xf32>
    %22 = vector.broadcast %21 : vector<1x96xf32> to vector<16x96xf32>
    %23 = arith.addf %18, %22 : vector<16x96xf32>
    %24 = vector.extract_strided_slice %23 {offsets = [0, 0], sizes = [16, 16], strides = [1, 1]} : vector<16x96xf32> to vector<16x16xf32>
    %25 = vector.shape_cast %24 : vector<16x16xf32> to vector<2x8x16xf32>
    %26 = vector.extract_strided_slice %23 {offsets = [0, 32], sizes = [16, 16], strides = [1, 1]} : vector<16x96xf32> to vector<16x16xf32>
    %27 = vector.shape_cast %26 : vector<16x16xf32> to vector<2x8x16xf32>
    %28 = vector.extract_strided_slice %23 {offsets = [0, 64], sizes = [16, 16], strides = [1, 1]} : vector<16x96xf32> to vector<16x16xf32>
    %29 = vector.shape_cast %28 : vector<16x16xf32> to vector<2x8x16xf32>
    "tpu.trace_start"() <{level = 10 : i32, message = "bqe,bke->bqk"}> : () -> ()
    %cst_13 = arith.constant dense<0.000000e+00> : vector<2x8x8xf32>
    %30 = tpu.matmul %25, %27, %cst_13 {dimension_numbers = #tpu.dot_dimension_numbers<[2], [2], [1], [1], [0, 0, 0, 1, 1, 1], [0], [0]>} : vector<2x8x16xf32>, vector<2x8x16xf32>, vector<2x8x8xf32> -> vector<2x8x8xf32>
    "tpu.trace_stop"() : () -> ()
    %31 = arith.addf %30, %15 : vector<2x8x8xf32>
    %cst_14 = arith.constant dense<0xFF800000> : vector<2x8xf32>
    %32 = vector.multi_reduction <maximumf>, %31, %cst_14 [2] : vector<2x8x8xf32> to vector<2x8xf32>
    %33 = vector.shape_cast %32 : vector<2x8xf32> to vector<2x8x1xf32>
    %34 = vector.broadcast %33 : vector<2x8x1xf32> to vector<2x8x8xf32>
    %35 = arith.subf %31, %34 : vector<2x8x8xf32>
    %36 = math.exp %35 : vector<2x8x8xf32>
    %cst_15 = arith.constant dense<0.000000e+00> : vector<2x8xf32>
    %37 = vector.multi_reduction <add>, %36, %cst_15 [2] : vector<2x8x8xf32> to vector<2x8xf32>
    %38 = vector.shape_cast %37 : vector<2x8xf32> to vector<2x8x1xf32>
    %cst_16 = arith.constant 1.000000e+00 : f32
    %39 = vector.broadcast %cst_16 : f32 to vector<2x8x1xf32>
    %40 = arith.divf %39, %38 : vector<2x8x1xf32>
    %41 = vector.broadcast %40 : vector<2x8x1xf32> to vector<2x8x8xf32>
    %42 = arith.mulf %36, %41 : vector<2x8x8xf32>
    "tpu.trace_start"() <{level = 10 : i32, message = "bqk,bke->bqe"}> : () -> ()
    %cst_17 = arith.constant dense<0.000000e+00> : vector<2x8x16xf32>
    %43 = tpu.matmul %42, %29, %cst_17 {dimension_numbers = #tpu.dot_dimension_numbers<[2], [1], [1], [2], [0, 0, 0, 1, 1, 2], [0], [0]>} : vector<2x8x8xf32>, vector<2x8x16xf32>, vector<2x8x16xf32> -> vector<2x8x16xf32>
    "tpu.trace_stop"() : () -> ()
    %44 = vector.shape_cast %43 : vector<2x8x16xf32> to vector<16x16xf32>
    %45 = vector.extract_strided_slice %23 {offsets = [0, 16], sizes = [16, 16], strides = [1, 1]} : vector<16x96xf32> to vector<16x16xf32>
    %46 = vector.shape_cast %45 : vector<16x16xf32> to vector<2x8x16xf32>
    %47 = vector.extract_strided_slice %23 {offsets = [0, 48], sizes = [16, 16], strides = [1, 1]} : vector<16x96xf32> to vector<16x16xf32>
    %48 = vector.shape_cast %47 : vector<16x16xf32> to vector<2x8x16xf32>
    %49 = vector.extract_strided_slice %23 {offsets = [0, 80], sizes = [16, 16], strides = [1, 1]} : vector<16x96xf32> to vector<16x16xf32>
    %50 = vector.shape_cast %49 : vector<16x16xf32> to vector<2x8x16xf32>
    "tpu.trace_start"() <{level = 10 : i32, message = "bqe,bke->bqk"}> : () -> ()
    %cst_18 = arith.constant dense<0.000000e+00> : vector<2x8x8xf32>
    %51 = tpu.matmul %46, %48, %cst_18 {dimension_numbers = #tpu.dot_dimension_numbers<[2], [2], [1], [1], [0, 0, 0, 1, 1, 1], [0], [0]>} : vector<2x8x16xf32>, vector<2x8x16xf32>, vector<2x8x8xf32> -> vector<2x8x8xf32>
    "tpu.trace_stop"() : () -> ()
    %52 = arith.addf %51, %15 : vector<2x8x8xf32>
    %cst_19 = arith.constant dense<0xFF800000> : vector<2x8xf32>
    %53 = vector.multi_reduction <maximumf>, %52, %cst_19 [2] : vector<2x8x8xf32> to vector<2x8xf32>
    %54 = vector.shape_cast %53 : vector<2x8xf32> to vector<2x8x1xf32>
    %55 = vector.broadcast %54 : vector<2x8x1xf32> to vector<2x8x8xf32>
    %56 = arith.subf %52, %55 : vector<2x8x8xf32>
    %57 = math.exp %56 : vector<2x8x8xf32>
    %cst_20 = arith.constant dense<0.000000e+00> : vector<2x8xf32>
    %58 = vector.multi_reduction <add>, %57, %cst_20 [2] : vector<2x8x8xf32> to vector<2x8xf32>
    %59 = vector.shape_cast %58 : vector<2x8xf32> to vector<2x8x1xf32>
    %cst_21 = arith.constant 1.000000e+00 : f32
    %60 = vector.broadcast %cst_21 : f32 to vector<2x8x1xf32>
    %61 = arith.divf %60, %59 : vector<2x8x1xf32>
    %62 = vector.broadcast %61 : vector<2x8x1xf32> to vector<2x8x8xf32>
    %63 = arith.mulf %57, %62 : vector<2x8x8xf32>
    "tpu.trace_start"() <{level = 10 : i32, message = "bqk,bke->bqe"}> : () -> ()
    %cst_22 = arith.constant dense<0.000000e+00> : vector<2x8x16xf32>
    %64 = tpu.matmul %63, %50, %cst_22 {dimension_numbers = #tpu.dot_dimension_numbers<[2], [1], [1], [2], [0, 0, 0, 1, 1, 2], [0], [0]>} : vector<2x8x8xf32>, vector<2x8x16xf32>, vector<2x8x16xf32> -> vector<2x8x16xf32>
    "tpu.trace_stop"() : () -> ()
    %65 = vector.shape_cast %64 : vector<2x8x16xf32> to vector<16x16xf32>
    %66 = tpu.concatenate %44, %65 in 1 : vector<16x16xf32>, vector<16x16xf32> -> vector<16x32xf32>
    %c0_23 = arith.constant 0 : index
    %c0_24 = arith.constant 0 : index
    %c0_25 = arith.constant 0 : index
    %67 = vector.load %arg6[%c0_23, %c0_24, %c0_25] : memref<3x32x32xf32, #tpu.memory_space<vmem>>, vector<1x32x32xf32>
    %68 = vector.shape_cast %67 : vector<1x32x32xf32> to vector<32x32xf32>
    %cst_26 = arith.constant dense<0.000000e+00> : vector<16x32xf32>
    %69 = tpu.matmul %66, %68, %cst_26 {dimension_numbers = #tpu.dot_dimension_numbers<[1], [0], [0], [1], [0, 0, 1, 1], [], []>} : vector<16x32xf32>, vector<32x32xf32>, vector<16x32xf32> -> vector<16x32xf32>
    %c0_27 = arith.constant 0 : index
    %c0_28 = arith.constant 0 : index
    %c0_29 = arith.constant 0 : index
    %70 = vector.load %arg7[%c0_27, %c0_28, %c0_29] : memref<6x3x32xf32, #tpu.memory_space<vmem>>, vector<1x1x32xf32>
    %71 = vector.shape_cast %70 : vector<1x1x32xf32> to vector<32xf32>
    %72 = vector.shape_cast %71 : vector<32xf32> to vector<1x32xf32>
    %73 = vector.broadcast %72 : vector<1x32xf32> to vector<16x32xf32>
    %74 = arith.addf %69, %73 : vector<16x32xf32>
    %75 = arith.addf %0, %74 : vector<16x32xf32>
    %c1 = arith.constant 1 : index
    %c0_30 = arith.constant 0 : index
    %c0_31 = arith.constant 0 : index
    %76 = vector.load %arg7[%c1, %c0_30, %c0_31] : memref<6x3x32xf32, #tpu.memory_space<vmem>>, vector<1x1x32xf32>
    %77 = vector.shape_cast %76 : vector<1x1x32xf32> to vector<32xf32>
    %c2 = arith.constant 2 : index
    %c0_32 = arith.constant 0 : index
    %c0_33 = arith.constant 0 : index
    %78 = vector.load %arg7[%c2, %c0_32, %c0_33] : memref<6x3x32xf32, #tpu.memory_space<vmem>>, vector<1x1x32xf32>
    %79 = vector.shape_cast %78 : vector<1x1x32xf32> to vector<32xf32>
    %cst_34 = arith.constant dense<0.000000e+00> : vector<16xf32>
    %80 = vector.multi_reduction <add>, %75, %cst_34 [1] : vector<16x32xf32> to vector<16xf32>
    %81 = vector.shape_cast %80 : vector<16xf32> to vector<16x1xf32>
    %cst_35 = arith.constant 3.200000e+01 : f32
    %82 = vector.broadcast %cst_35 : f32 to vector<16x1xf32>
    %83 = arith.divf %81, %82 : vector<16x1xf32>
    %84 = vector.broadcast %83 : vector<16x1xf32> to vector<16x32xf32>
    %85 = arith.subf %75, %84 : vector<16x32xf32>
    %86 = arith.mulf %85, %85 : vector<16x32xf32>
    %cst_36 = arith.constant dense<0.000000e+00> : vector<16xf32>
    %87 = vector.multi_reduction <add>, %86, %cst_36 [1] : vector<16x32xf32> to vector<16xf32>
    %88 = vector.shape_cast %87 : vector<16xf32> to vector<16x1xf32>
    %cst_37 = arith.constant 3.200000e+01 : f32
    %89 = vector.broadcast %cst_37 : f32 to vector<16x1xf32>
    %90 = arith.divf %88, %89 : vector<16x1xf32>
    %91 = vector.broadcast %83 : vector<16x1xf32> to vector<16x32xf32>
    %92 = arith.subf %75, %91 : vector<16x32xf32>
    %cst_38 = arith.constant 9.99999974E-6 : f32
    %93 = vector.broadcast %cst_38 : f32 to vector<16x1xf32>
    %94 = arith.addf %90, %93 : vector<16x1xf32>
    %95 = math.rsqrt %94 : vector<16x1xf32>
    %96 = vector.broadcast %95 : vector<16x1xf32> to vector<16x32xf32>
    %97 = arith.mulf %92, %96 : vector<16x32xf32>
    %98 = vector.shape_cast %77 : vector<32xf32> to vector<1x32xf32>
    %99 = vector.broadcast %98 : vector<1x32xf32> to vector<16x32xf32>
    %100 = arith.mulf %97, %99 : vector<16x32xf32>
    %101 = vector.shape_cast %79 : vector<32xf32> to vector<1x32xf32>
    %102 = vector.broadcast %101 : vector<1x32xf32> to vector<16x32xf32>
    %103 = arith.addf %100, %102 : vector<16x32xf32>
    %c0_39 = arith.constant 0 : index
    %c0_40 = arith.constant 0 : index
    %c0_41 = arith.constant 0 : index
    %104 = vector.load %arg8[%c0_39, %c0_40, %c0_41] : memref<3x32x64xf32, #tpu.memory_space<vmem>>, vector<1x32x64xf32>
    %105 = vector.shape_cast %104 : vector<1x32x64xf32> to vector<32x64xf32>
    %cst_42 = arith.constant dense<0.000000e+00> : vector<16x64xf32>
    %106 = tpu.matmul %103, %105, %cst_42 {dimension_numbers = #tpu.dot_dimension_numbers<[1], [0], [0], [1], [0, 0, 1, 1], [], []>} : vector<16x32xf32>, vector<32x64xf32>, vector<16x64xf32> -> vector<16x64xf32>
    %c0_43 = arith.constant 0 : index
    %c0_44 = arith.constant 0 : index
    %107 = vector.load %arg9[%c0_43, %c0_44] : memref<3x64xf32, #tpu.memory_space<vmem>>, vector<1x64xf32>
    %108 = vector.shape_cast %107 : vector<1x64xf32> to vector<64xf32>
    %109 = vector.shape_cast %108 : vector<64xf32> to vector<1x64xf32>
    %110 = vector.broadcast %109 : vector<1x64xf32> to vector<16x64xf32>
    %111 = arith.addf %106, %110 : vector<16x64xf32>
    %cst_45 = arith.constant 0.000000e+00 : f32
    %112 = vector.broadcast %cst_45 : f32 to vector<16x64xf32>
    %113 = arith.maximumf %111, %112 : vector<16x64xf32>
    %c0_46 = arith.constant 0 : index
    %c0_47 = arith.constant 0 : index
    %c0_48 = arith.constant 0 : index
    %114 = vector.load %arg10[%c0_46, %c0_47, %c0_48] : memref<3x64x32xf32, #tpu.memory_space<vmem>>, vector<1x64x32xf32>
    %115 = vector.shape_cast %114 : vector<1x64x32xf32> to vector<64x32xf32>
    %cst_49 = arith.constant dense<0.000000e+00> : vector<16x32xf32>
    %116 = tpu.matmul %113, %115, %cst_49 {dimension_numbers = #tpu.dot_dimension_numbers<[1], [0], [0], [1], [0, 0, 1, 1], [], []>} : vector<16x64xf32>, vector<64x32xf32>, vector<16x32xf32> -> vector<16x32xf32>
    %c3 = arith.constant 3 : index
    %c0_50 = arith.constant 0 : index
    %c0_51 = arith.constant 0 : index
    %117 = vector.load %arg7[%c3, %c0_50, %c0_51] : memref<6x3x32xf32, #tpu.memory_space<vmem>>, vector<1x1x32xf32>
    %118 = vector.shape_cast %117 : vector<1x1x32xf32> to vector<32xf32>
    %119 = vector.shape_cast %118 : vector<32xf32> to vector<1x32xf32>
    %120 = vector.broadcast %119 : vector<1x32xf32> to vector<16x32xf32>
    %121 = arith.addf %116, %120 : vector<16x32xf32>
    %122 = arith.addf %103, %121 : vector<16x32xf32>
    %c4 = arith.constant 4 : index
    %c0_52 = arith.constant 0 : index
    %c0_53 = arith.constant 0 : index
    %123 = vector.load %arg7[%c4, %c0_52, %c0_53] : memref<6x3x32xf32, #tpu.memory_space<vmem>>, vector<1x1x32xf32>
    %124 = vector.shape_cast %123 : vector<1x1x32xf32> to vector<32xf32>
    %c5 = arith.constant 5 : index
    %c0_54 = arith.constant 0 : index
    %c0_55 = arith.constant 0 : index
    %125 = vector.load %arg7[%c5, %c0_54, %c0_55] : memref<6x3x32xf32, #tpu.memory_space<vmem>>, vector<1x1x32xf32>
    %126 = vector.shape_cast %125 : vector<1x1x32xf32> to vector<32xf32>
    %cst_56 = arith.constant dense<0.000000e+00> : vector<16xf32>
    %127 = vector.multi_reduction <add>, %122, %cst_56 [1] : vector<16x32xf32> to vector<16xf32>
    %128 = vector.shape_cast %127 : vector<16xf32> to vector<16x1xf32>
    %cst_57 = arith.constant 3.200000e+01 : f32
    %129 = vector.broadcast %cst_57 : f32 to vector<16x1xf32>
    %130 = arith.divf %128, %129 : vector<16x1xf32>
    %131 = vector.broadcast %130 : vector<16x1xf32> to vector<16x32xf32>
    %132 = arith.subf %122, %131 : vector<16x32xf32>
    %133 = arith.mulf %132, %132 : vector<16x32xf32>
    %cst_58 = arith.constant dense<0.000000e+00> : vector<16xf32>
    %134 = vector.multi_reduction <add>, %133, %cst_58 [1] : vector<16x32xf32> to vector<16xf32>
    %135 = vector.shape_cast %134 : vector<16xf32> to vector<16x1xf32>
    %cst_59 = arith.constant 3.200000e+01 : f32
    %136 = vector.broadcast %cst_59 : f32 to vector<16x1xf32>
    %137 = arith.divf %135, %136 : vector<16x1xf32>
    %138 = vector.broadcast %130 : vector<16x1xf32> to vector<16x32xf32>
    %139 = arith.subf %122, %138 : vector<16x32xf32>
    %cst_60 = arith.constant 9.99999974E-6 : f32
    %140 = vector.broadcast %cst_60 : f32 to vector<16x1xf32>
    %141 = arith.addf %137, %140 : vector<16x1xf32>
    %142 = math.rsqrt %141 : vector<16x1xf32>
    %143 = vector.broadcast %142 : vector<16x1xf32> to vector<16x32xf32>
    %144 = arith.mulf %139, %143 : vector<16x32xf32>
    %145 = vector.shape_cast %124 : vector<32xf32> to vector<1x32xf32>
    %146 = vector.broadcast %145 : vector<1x32xf32> to vector<16x32xf32>
    %147 = arith.mulf %144, %146 : vector<16x32xf32>
    %148 = vector.shape_cast %126 : vector<32xf32> to vector<1x32xf32>
    %149 = vector.broadcast %148 : vector<1x32xf32> to vector<16x32xf32>
    %150 = arith.addf %147, %149 : vector<16x32xf32>
    %c1_61 = arith.constant 1 : index
    %c0_62 = arith.constant 0 : index
    %c0_63 = arith.constant 0 : index
    %151 = vector.load %arg4[%c1_61, %c0_62, %c0_63] : memref<3x32x96xf32, #tpu.memory_space<vmem>>, vector<1x32x96xf32>
    %152 = vector.shape_cast %151 : vector<1x32x96xf32> to vector<32x96xf32>
    %cst_64 = arith.constant dense<0.000000e+00> : vector<16x96xf32>
    %153 = tpu.matmul %150, %152, %cst_64 {dimension_numbers = #tpu.dot_dimension_numbers<[1], [0], [0], [1], [0, 0, 1, 1], [], []>} : vector<16x32xf32>, vector<32x96xf32>, vector<16x96xf32> -> vector<16x96xf32>
    %c1_65 = arith.constant 1 : index
    %c0_66 = arith.constant 0 : index
    %154 = vector.load %arg5[%c1_65, %c0_66] : memref<3x96xf32, #tpu.memory_space<vmem>>, vector<1x96xf32>
    %155 = vector.shape_cast %154 : vector<1x96xf32> to vector<96xf32>
    %156 = vector.shape_cast %155 : vector<96xf32> to vector<1x96xf32>
    %157 = vector.broadcast %156 : vector<1x96xf32> to vector<16x96xf32>
    %158 = arith.addf %153, %157 : vector<16x96xf32>
    %159 = vector.extract_strided_slice %158 {offsets = [0, 0], sizes = [16, 16], strides = [1, 1]} : vector<16x96xf32> to vector<16x16xf32>
    %160 = vector.shape_cast %159 : vector<16x16xf32> to vector<2x8x16xf32>
    %161 = vector.extract_strided_slice %158 {offsets = [0, 32], sizes = [16, 16], strides = [1, 1]} : vector<16x96xf32> to vector<16x16xf32>
    %162 = vector.shape_cast %161 : vector<16x16xf32> to vector<2x8x16xf32>
    %163 = vector.extract_strided_slice %158 {offsets = [0, 64], sizes = [16, 16], strides = [1, 1]} : vector<16x96xf32> to vector<16x16xf32>
    %164 = vector.shape_cast %163 : vector<16x16xf32> to vector<2x8x16xf32>
    "tpu.trace_start"() <{level = 10 : i32, message = "bqe,bke->bqk"}> : () -> ()
    %cst_67 = arith.constant dense<0.000000e+00> : vector<2x8x8xf32>
    %165 = tpu.matmul %160, %162, %cst_67 {dimension_numbers = #tpu.dot_dimension_numbers<[2], [2], [1], [1], [0, 0, 0, 1, 1, 1], [0], [0]>} : vector<2x8x16xf32>, vector<2x8x16xf32>, vector<2x8x8xf32> -> vector<2x8x8xf32>
    "tpu.trace_stop"() : () -> ()
    %166 = arith.addf %165, %15 : vector<2x8x8xf32>
    %cst_68 = arith.constant dense<0xFF800000> : vector<2x8xf32>
    %167 = vector.multi_reduction <maximumf>, %166, %cst_68 [2] : vector<2x8x8xf32> to vector<2x8xf32>
    %168 = vector.shape_cast %167 : vector<2x8xf32> to vector<2x8x1xf32>
    %169 = vector.broadcast %168 : vector<2x8x1xf32> to vector<2x8x8xf32>
    %170 = arith.subf %166, %169 : vector<2x8x8xf32>
    %171 = math.exp %170 : vector<2x8x8xf32>
    %cst_69 = arith.constant dense<0.000000e+00> : vector<2x8xf32>
    %172 = vector.multi_reduction <add>, %171, %cst_69 [2] : vector<2x8x8xf32> to vector<2x8xf32>
    %173 = vector.shape_cast %172 : vector<2x8xf32> to vector<2x8x1xf32>
    %cst_70 = arith.constant 1.000000e+00 : f32
    %174 = vector.broadcast %cst_70 : f32 to vector<2x8x1xf32>
    %175 = arith.divf %174, %173 : vector<2x8x1xf32>
    %176 = vector.broadcast %175 : vector<2x8x1xf32> to vector<2x8x8xf32>
    %177 = arith.mulf %171, %176 : vector<2x8x8xf32>
    "tpu.trace_start"() <{level = 10 : i32, message = "bqk,bke->bqe"}> : () -> ()
    %cst_71 = arith.constant dense<0.000000e+00> : vector<2x8x16xf32>
    %178 = tpu.matmul %177, %164, %cst_71 {dimension_numbers = #tpu.dot_dimension_numbers<[2], [1], [1], [2], [0, 0, 0, 1, 1, 2], [0], [0]>} : vector<2x8x8xf32>, vector<2x8x16xf32>, vector<2x8x16xf32> -> vector<2x8x16xf32>
    "tpu.trace_stop"() : () -> ()
    %179 = vector.shape_cast %178 : vector<2x8x16xf32> to vector<16x16xf32>
    %180 = vector.extract_strided_slice %158 {offsets = [0, 16], sizes = [16, 16], strides = [1, 1]} : vector<16x96xf32> to vector<16x16xf32>
    %181 = vector.shape_cast %180 : vector<16x16xf32> to vector<2x8x16xf32>
    %182 = vector.extract_strided_slice %158 {offsets = [0, 48], sizes = [16, 16], strides = [1, 1]} : vector<16x96xf32> to vector<16x16xf32>
    %183 = vector.shape_cast %182 : vector<16x16xf32> to vector<2x8x16xf32>
    %184 = vector.extract_strided_slice %158 {offsets = [0, 80], sizes = [16, 16], strides = [1, 1]} : vector<16x96xf32> to vector<16x16xf32>
    %185 = vector.shape_cast %184 : vector<16x16xf32> to vector<2x8x16xf32>
    "tpu.trace_start"() <{level = 10 : i32, message = "bqe,bke->bqk"}> : () -> ()
    %cst_72 = arith.constant dense<0.000000e+00> : vector<2x8x8xf32>
    %186 = tpu.matmul %181, %183, %cst_72 {dimension_numbers = #tpu.dot_dimension_numbers<[2], [2], [1], [1], [0, 0, 0, 1, 1, 1], [0], [0]>} : vector<2x8x16xf32>, vector<2x8x16xf32>, vector<2x8x8xf32> -> vector<2x8x8xf32>
    "tpu.trace_stop"() : () -> ()
    %187 = arith.addf %186, %15 : vector<2x8x8xf32>
    %cst_73 = arith.constant dense<0xFF800000> : vector<2x8xf32>
    %188 = vector.multi_reduction <maximumf>, %187, %cst_73 [2] : vector<2x8x8xf32> to vector<2x8xf32>
    %189 = vector.shape_cast %188 : vector<2x8xf32> to vector<2x8x1xf32>
    %190 = vector.broadcast %189 : vector<2x8x1xf32> to vector<2x8x8xf32>
    %191 = arith.subf %187, %190 : vector<2x8x8xf32>
    %192 = math.exp %191 : vector<2x8x8xf32>
    %cst_74 = arith.constant dense<0.000000e+00> : vector<2x8xf32>
    %193 = vector.multi_reduction <add>, %192, %cst_74 [2] : vector<2x8x8xf32> to vector<2x8xf32>
    %194 = vector.shape_cast %193 : vector<2x8xf32> to vector<2x8x1xf32>
    %cst_75 = arith.constant 1.000000e+00 : f32
    %195 = vector.broadcast %cst_75 : f32 to vector<2x8x1xf32>
    %196 = arith.divf %195, %194 : vector<2x8x1xf32>
    %197 = vector.broadcast %196 : vector<2x8x1xf32> to vector<2x8x8xf32>
    %198 = arith.mulf %192, %197 : vector<2x8x8xf32>
    "tpu.trace_start"() <{level = 10 : i32, message = "bqk,bke->bqe"}> : () -> ()
    %cst_76 = arith.constant dense<0.000000e+00> : vector<2x8x16xf32>
    %199 = tpu.matmul %198, %185, %cst_76 {dimension_numbers = #tpu.dot_dimension_numbers<[2], [1], [1], [2], [0, 0, 0, 1, 1, 2], [0], [0]>} : vector<2x8x8xf32>, vector<2x8x16xf32>, vector<2x8x16xf32> -> vector<2x8x16xf32>
    "tpu.trace_stop"() : () -> ()
    %200 = vector.shape_cast %199 : vector<2x8x16xf32> to vector<16x16xf32>
    %201 = tpu.concatenate %179, %200 in 1 : vector<16x16xf32>, vector<16x16xf32> -> vector<16x32xf32>
    %c1_77 = arith.constant 1 : index
    %c0_78 = arith.constant 0 : index
    %c0_79 = arith.constant 0 : index
    %202 = vector.load %arg6[%c1_77, %c0_78, %c0_79] : memref<3x32x32xf32, #tpu.memory_space<vmem>>, vector<1x32x32xf32>
    %203 = vector.shape_cast %202 : vector<1x32x32xf32> to vector<32x32xf32>
    %cst_80 = arith.constant dense<0.000000e+00> : vector<16x32xf32>
    %204 = tpu.matmul %201, %203, %cst_80 {dimension_numbers = #tpu.dot_dimension_numbers<[1], [0], [0], [1], [0, 0, 1, 1], [], []>} : vector<16x32xf32>, vector<32x32xf32>, vector<16x32xf32> -> vector<16x32xf32>
    %c0_81 = arith.constant 0 : index
    %c1_82 = arith.constant 1 : index
    %c0_83 = arith.constant 0 : index
    %205 = vector.load %arg7[%c0_81, %c1_82, %c0_83] : memref<6x3x32xf32, #tpu.memory_space<vmem>>, vector<1x1x32xf32>
    %206 = vector.shape_cast %205 : vector<1x1x32xf32> to vector<32xf32>
    %207 = vector.shape_cast %206 : vector<32xf32> to vector<1x32xf32>
    %208 = vector.broadcast %207 : vector<1x32xf32> to vector<16x32xf32>
    %209 = arith.addf %204, %208 : vector<16x32xf32>
    %210 = arith.addf %150, %209 : vector<16x32xf32>
    %c1_84 = arith.constant 1 : index
    %c1_85 = arith.constant 1 : index
    %c0_86 = arith.constant 0 : index
    %211 = vector.load %arg7[%c1_84, %c1_85, %c0_86] : memref<6x3x32xf32, #tpu.memory_space<vmem>>, vector<1x1x32xf32>
    %212 = vector.shape_cast %211 : vector<1x1x32xf32> to vector<32xf32>
    %c2_87 = arith.constant 2 : index
    %c1_88 = arith.constant 1 : index
    %c0_89 = arith.constant 0 : index
    %213 = vector.load %arg7[%c2_87, %c1_88, %c0_89] : memref<6x3x32xf32, #tpu.memory_space<vmem>>, vector<1x1x32xf32>
    %214 = vector.shape_cast %213 : vector<1x1x32xf32> to vector<32xf32>
    %cst_90 = arith.constant dense<0.000000e+00> : vector<16xf32>
    %215 = vector.multi_reduction <add>, %210, %cst_90 [1] : vector<16x32xf32> to vector<16xf32>
    %216 = vector.shape_cast %215 : vector<16xf32> to vector<16x1xf32>
    %cst_91 = arith.constant 3.200000e+01 : f32
    %217 = vector.broadcast %cst_91 : f32 to vector<16x1xf32>
    %218 = arith.divf %216, %217 : vector<16x1xf32>
    %219 = vector.broadcast %218 : vector<16x1xf32> to vector<16x32xf32>
    %220 = arith.subf %210, %219 : vector<16x32xf32>
    %221 = arith.mulf %220, %220 : vector<16x32xf32>
    %cst_92 = arith.constant dense<0.000000e+00> : vector<16xf32>
    %222 = vector.multi_reduction <add>, %221, %cst_92 [1] : vector<16x32xf32> to vector<16xf32>
    %223 = vector.shape_cast %222 : vector<16xf32> to vector<16x1xf32>
    %cst_93 = arith.constant 3.200000e+01 : f32
    %224 = vector.broadcast %cst_93 : f32 to vector<16x1xf32>
    %225 = arith.divf %223, %224 : vector<16x1xf32>
    %226 = vector.broadcast %218 : vector<16x1xf32> to vector<16x32xf32>
    %227 = arith.subf %210, %226 : vector<16x32xf32>
    %cst_94 = arith.constant 9.99999974E-6 : f32
    %228 = vector.broadcast %cst_94 : f32 to vector<16x1xf32>
    %229 = arith.addf %225, %228 : vector<16x1xf32>
    %230 = math.rsqrt %229 : vector<16x1xf32>
    %231 = vector.broadcast %230 : vector<16x1xf32> to vector<16x32xf32>
    %232 = arith.mulf %227, %231 : vector<16x32xf32>
    %233 = vector.shape_cast %212 : vector<32xf32> to vector<1x32xf32>
    %234 = vector.broadcast %233 : vector<1x32xf32> to vector<16x32xf32>
    %235 = arith.mulf %232, %234 : vector<16x32xf32>
    %236 = vector.shape_cast %214 : vector<32xf32> to vector<1x32xf32>
    %237 = vector.broadcast %236 : vector<1x32xf32> to vector<16x32xf32>
    %238 = arith.addf %235, %237 : vector<16x32xf32>
    %c1_95 = arith.constant 1 : index
    %c0_96 = arith.constant 0 : index
    %c0_97 = arith.constant 0 : index
    %239 = vector.load %arg8[%c1_95, %c0_96, %c0_97] : memref<3x32x64xf32, #tpu.memory_space<vmem>>, vector<1x32x64xf32>
    %240 = vector.shape_cast %239 : vector<1x32x64xf32> to vector<32x64xf32>
    %cst_98 = arith.constant dense<0.000000e+00> : vector<16x64xf32>
    %241 = tpu.matmul %238, %240, %cst_98 {dimension_numbers = #tpu.dot_dimension_numbers<[1], [0], [0], [1], [0, 0, 1, 1], [], []>} : vector<16x32xf32>, vector<32x64xf32>, vector<16x64xf32> -> vector<16x64xf32>
    %c1_99 = arith.constant 1 : index
    %c0_100 = arith.constant 0 : index
    %242 = vector.load %arg9[%c1_99, %c0_100] : memref<3x64xf32, #tpu.memory_space<vmem>>, vector<1x64xf32>
    %243 = vector.shape_cast %242 : vector<1x64xf32> to vector<64xf32>
    %244 = vector.shape_cast %243 : vector<64xf32> to vector<1x64xf32>
    %245 = vector.broadcast %244 : vector<1x64xf32> to vector<16x64xf32>
    %246 = arith.addf %241, %245 : vector<16x64xf32>
    %cst_101 = arith.constant 0.000000e+00 : f32
    %247 = vector.broadcast %cst_101 : f32 to vector<16x64xf32>
    %248 = arith.maximumf %246, %247 : vector<16x64xf32>
    %c1_102 = arith.constant 1 : index
    %c0_103 = arith.constant 0 : index
    %c0_104 = arith.constant 0 : index
    %249 = vector.load %arg10[%c1_102, %c0_103, %c0_104] : memref<3x64x32xf32, #tpu.memory_space<vmem>>, vector<1x64x32xf32>
    %250 = vector.shape_cast %249 : vector<1x64x32xf32> to vector<64x32xf32>
    %cst_105 = arith.constant dense<0.000000e+00> : vector<16x32xf32>
    %251 = tpu.matmul %248, %250, %cst_105 {dimension_numbers = #tpu.dot_dimension_numbers<[1], [0], [0], [1], [0, 0, 1, 1], [], []>} : vector<16x64xf32>, vector<64x32xf32>, vector<16x32xf32> -> vector<16x32xf32>
    %c3_106 = arith.constant 3 : index
    %c1_107 = arith.constant 1 : index
    %c0_108 = arith.constant 0 : index
    %252 = vector.load %arg7[%c3_106, %c1_107, %c0_108] : memref<6x3x32xf32, #tpu.memory_space<vmem>>, vector<1x1x32xf32>
    %253 = vector.shape_cast %252 : vector<1x1x32xf32> to vector<32xf32>
    %254 = vector.shape_cast %253 : vector<32xf32> to vector<1x32xf32>
    %255 = vector.broadcast %254 : vector<1x32xf32> to vector<16x32xf32>
    %256 = arith.addf %251, %255 : vector<16x32xf32>
    %257 = arith.addf %238, %256 : vector<16x32xf32>
    %c4_109 = arith.constant 4 : index
    %c1_110 = arith.constant 1 : index
    %c0_111 = arith.constant 0 : index
    %258 = vector.load %arg7[%c4_109, %c1_110, %c0_111] : memref<6x3x32xf32, #tpu.memory_space<vmem>>, vector<1x1x32xf32>
    %259 = vector.shape_cast %258 : vector<1x1x32xf32> to vector<32xf32>
    %c5_112 = arith.constant 5 : index
    %c1_113 = arith.constant 1 : index
    %c0_114 = arith.constant 0 : index
    %260 = vector.load %arg7[%c5_112, %c1_113, %c0_114] : memref<6x3x32xf32, #tpu.memory_space<vmem>>, vector<1x1x32xf32>
    %261 = vector.shape_cast %260 : vector<1x1x32xf32> to vector<32xf32>
    %cst_115 = arith.constant dense<0.000000e+00> : vector<16xf32>
    %262 = vector.multi_reduction <add>, %257, %cst_115 [1] : vector<16x32xf32> to vector<16xf32>
    %263 = vector.shape_cast %262 : vector<16xf32> to vector<16x1xf32>
    %cst_116 = arith.constant 3.200000e+01 : f32
    %264 = vector.broadcast %cst_116 : f32 to vector<16x1xf32>
    %265 = arith.divf %263, %264 : vector<16x1xf32>
    %266 = vector.broadcast %265 : vector<16x1xf32> to vector<16x32xf32>
    %267 = arith.subf %257, %266 : vector<16x32xf32>
    %268 = arith.mulf %267, %267 : vector<16x32xf32>
    %cst_117 = arith.constant dense<0.000000e+00> : vector<16xf32>
    %269 = vector.multi_reduction <add>, %268, %cst_117 [1] : vector<16x32xf32> to vector<16xf32>
    %270 = vector.shape_cast %269 : vector<16xf32> to vector<16x1xf32>
    %cst_118 = arith.constant 3.200000e+01 : f32
    %271 = vector.broadcast %cst_118 : f32 to vector<16x1xf32>
    %272 = arith.divf %270, %271 : vector<16x1xf32>
    %273 = vector.broadcast %265 : vector<16x1xf32> to vector<16x32xf32>
    %274 = arith.subf %257, %273 : vector<16x32xf32>
    %cst_119 = arith.constant 9.99999974E-6 : f32
    %275 = vector.broadcast %cst_119 : f32 to vector<16x1xf32>
    %276 = arith.addf %272, %275 : vector<16x1xf32>
    %277 = math.rsqrt %276 : vector<16x1xf32>
    %278 = vector.broadcast %277 : vector<16x1xf32> to vector<16x32xf32>
    %279 = arith.mulf %274, %278 : vector<16x32xf32>
    %280 = vector.shape_cast %259 : vector<32xf32> to vector<1x32xf32>
    %281 = vector.broadcast %280 : vector<1x32xf32> to vector<16x32xf32>
    %282 = arith.mulf %279, %281 : vector<16x32xf32>
    %283 = vector.shape_cast %261 : vector<32xf32> to vector<1x32xf32>
    %284 = vector.broadcast %283 : vector<1x32xf32> to vector<16x32xf32>
    %285 = arith.addf %282, %284 : vector<16x32xf32>
    %c2_120 = arith.constant 2 : index
    %c0_121 = arith.constant 0 : index
    %c0_122 = arith.constant 0 : index
    %286 = vector.load %arg4[%c2_120, %c0_121, %c0_122] : memref<3x32x96xf32, #tpu.memory_space<vmem>>, vector<1x32x96xf32>
    %287 = vector.shape_cast %286 : vector<1x32x96xf32> to vector<32x96xf32>
    %cst_123 = arith.constant dense<0.000000e+00> : vector<16x96xf32>
    %288 = tpu.matmul %285, %287, %cst_123 {dimension_numbers = #tpu.dot_dimension_numbers<[1], [0], [0], [1], [0, 0, 1, 1], [], []>} : vector<16x32xf32>, vector<32x96xf32>, vector<16x96xf32> -> vector<16x96xf32>
    %c2_124 = arith.constant 2 : index
    %c0_125 = arith.constant 0 : index
    %289 = vector.load %arg5[%c2_124, %c0_125] : memref<3x96xf32, #tpu.memory_space<vmem>>, vector<1x96xf32>
    %290 = vector.shape_cast %289 : vector<1x96xf32> to vector<96xf32>
    %291 = vector.shape_cast %290 : vector<96xf32> to vector<1x96xf32>
    %292 = vector.broadcast %291 : vector<1x96xf32> to vector<16x96xf32>
    %293 = arith.addf %288, %292 : vector<16x96xf32>
    %294 = vector.extract_strided_slice %293 {offsets = [0, 0], sizes = [16, 16], strides = [1, 1]} : vector<16x96xf32> to vector<16x16xf32>
    %295 = vector.shape_cast %294 : vector<16x16xf32> to vector<2x8x16xf32>
    %296 = vector.extract_strided_slice %293 {offsets = [0, 32], sizes = [16, 16], strides = [1, 1]} : vector<16x96xf32> to vector<16x16xf32>
    %297 = vector.shape_cast %296 : vector<16x16xf32> to vector<2x8x16xf32>
    %298 = vector.extract_strided_slice %293 {offsets = [0, 64], sizes = [16, 16], strides = [1, 1]} : vector<16x96xf32> to vector<16x16xf32>
    %299 = vector.shape_cast %298 : vector<16x16xf32> to vector<2x8x16xf32>
    "tpu.trace_start"() <{level = 10 : i32, message = "bqe,bke->bqk"}> : () -> ()
    %cst_126 = arith.constant dense<0.000000e+00> : vector<2x8x8xf32>
    %300 = tpu.matmul %295, %297, %cst_126 {dimension_numbers = #tpu.dot_dimension_numbers<[2], [2], [1], [1], [0, 0, 0, 1, 1, 1], [0], [0]>} : vector<2x8x16xf32>, vector<2x8x16xf32>, vector<2x8x8xf32> -> vector<2x8x8xf32>
    "tpu.trace_stop"() : () -> ()
    %301 = arith.addf %300, %15 : vector<2x8x8xf32>
    %cst_127 = arith.constant dense<0xFF800000> : vector<2x8xf32>
    %302 = vector.multi_reduction <maximumf>, %301, %cst_127 [2] : vector<2x8x8xf32> to vector<2x8xf32>
    %303 = vector.shape_cast %302 : vector<2x8xf32> to vector<2x8x1xf32>
    %304 = vector.broadcast %303 : vector<2x8x1xf32> to vector<2x8x8xf32>
    %305 = arith.subf %301, %304 : vector<2x8x8xf32>
    %306 = math.exp %305 : vector<2x8x8xf32>
    %cst_128 = arith.constant dense<0.000000e+00> : vector<2x8xf32>
    %307 = vector.multi_reduction <add>, %306, %cst_128 [2] : vector<2x8x8xf32> to vector<2x8xf32>
    %308 = vector.shape_cast %307 : vector<2x8xf32> to vector<2x8x1xf32>
    %cst_129 = arith.constant 1.000000e+00 : f32
    %309 = vector.broadcast %cst_129 : f32 to vector<2x8x1xf32>
    %310 = arith.divf %309, %308 : vector<2x8x1xf32>
    %311 = vector.broadcast %310 : vector<2x8x1xf32> to vector<2x8x8xf32>
    %312 = arith.mulf %306, %311 : vector<2x8x8xf32>
    "tpu.trace_start"() <{level = 10 : i32, message = "bqk,bke->bqe"}> : () -> ()
    %cst_130 = arith.constant dense<0.000000e+00> : vector<2x8x16xf32>
    %313 = tpu.matmul %312, %299, %cst_130 {dimension_numbers = #tpu.dot_dimension_numbers<[2], [1], [1], [2], [0, 0, 0, 1, 1, 2], [0], [0]>} : vector<2x8x8xf32>, vector<2x8x16xf32>, vector<2x8x16xf32> -> vector<2x8x16xf32>
    "tpu.trace_stop"() : () -> ()
    %314 = vector.shape_cast %313 : vector<2x8x16xf32> to vector<16x16xf32>
    %315 = vector.extract_strided_slice %293 {offsets = [0, 16], sizes = [16, 16], strides = [1, 1]} : vector<16x96xf32> to vector<16x16xf32>
    %316 = vector.shape_cast %315 : vector<16x16xf32> to vector<2x8x16xf32>
    %317 = vector.extract_strided_slice %293 {offsets = [0, 48], sizes = [16, 16], strides = [1, 1]} : vector<16x96xf32> to vector<16x16xf32>
    %318 = vector.shape_cast %317 : vector<16x16xf32> to vector<2x8x16xf32>
    %319 = vector.extract_strided_slice %293 {offsets = [0, 80], sizes = [16, 16], strides = [1, 1]} : vector<16x96xf32> to vector<16x16xf32>
    %320 = vector.shape_cast %319 : vector<16x16xf32> to vector<2x8x16xf32>
    "tpu.trace_start"() <{level = 10 : i32, message = "bqe,bke->bqk"}> : () -> ()
    %cst_131 = arith.constant dense<0.000000e+00> : vector<2x8x8xf32>
    %321 = tpu.matmul %316, %318, %cst_131 {dimension_numbers = #tpu.dot_dimension_numbers<[2], [2], [1], [1], [0, 0, 0, 1, 1, 1], [0], [0]>} : vector<2x8x16xf32>, vector<2x8x16xf32>, vector<2x8x8xf32> -> vector<2x8x8xf32>
    "tpu.trace_stop"() : () -> ()
    %322 = arith.addf %321, %15 : vector<2x8x8xf32>
    %cst_132 = arith.constant dense<0xFF800000> : vector<2x8xf32>
    %323 = vector.multi_reduction <maximumf>, %322, %cst_132 [2] : vector<2x8x8xf32> to vector<2x8xf32>
    %324 = vector.shape_cast %323 : vector<2x8xf32> to vector<2x8x1xf32>
    %325 = vector.broadcast %324 : vector<2x8x1xf32> to vector<2x8x8xf32>
    %326 = arith.subf %322, %325 : vector<2x8x8xf32>
    %327 = math.exp %326 : vector<2x8x8xf32>
    %cst_133 = arith.constant dense<0.000000e+00> : vector<2x8xf32>
    %328 = vector.multi_reduction <add>, %327, %cst_133 [2] : vector<2x8x8xf32> to vector<2x8xf32>
    %329 = vector.shape_cast %328 : vector<2x8xf32> to vector<2x8x1xf32>
    %cst_134 = arith.constant 1.000000e+00 : f32
    %330 = vector.broadcast %cst_134 : f32 to vector<2x8x1xf32>
    %331 = arith.divf %330, %329 : vector<2x8x1xf32>
    %332 = vector.broadcast %331 : vector<2x8x1xf32> to vector<2x8x8xf32>
    %333 = arith.mulf %327, %332 : vector<2x8x8xf32>
    "tpu.trace_start"() <{level = 10 : i32, message = "bqk,bke->bqe"}> : () -> ()
    %cst_135 = arith.constant dense<0.000000e+00> : vector<2x8x16xf32>
    %334 = tpu.matmul %333, %320, %cst_135 {dimension_numbers = #tpu.dot_dimension_numbers<[2], [1], [1], [2], [0, 0, 0, 1, 1, 2], [0], [0]>} : vector<2x8x8xf32>, vector<2x8x16xf32>, vector<2x8x16xf32> -> vector<2x8x16xf32>
    "tpu.trace_stop"() : () -> ()
    %335 = vector.shape_cast %334 : vector<2x8x16xf32> to vector<16x16xf32>
    %336 = tpu.concatenate %314, %335 in 1 : vector<16x16xf32>, vector<16x16xf32> -> vector<16x32xf32>
    %c2_136 = arith.constant 2 : index
    %c0_137 = arith.constant 0 : index
    %c0_138 = arith.constant 0 : index
    %337 = vector.load %arg6[%c2_136, %c0_137, %c0_138] : memref<3x32x32xf32, #tpu.memory_space<vmem>>, vector<1x32x32xf32>
    %338 = vector.shape_cast %337 : vector<1x32x32xf32> to vector<32x32xf32>
    %cst_139 = arith.constant dense<0.000000e+00> : vector<16x32xf32>
    %339 = tpu.matmul %336, %338, %cst_139 {dimension_numbers = #tpu.dot_dimension_numbers<[1], [0], [0], [1], [0, 0, 1, 1], [], []>} : vector<16x32xf32>, vector<32x32xf32>, vector<16x32xf32> -> vector<16x32xf32>
    %c0_140 = arith.constant 0 : index
    %c2_141 = arith.constant 2 : index
    %c0_142 = arith.constant 0 : index
    %340 = vector.load %arg7[%c0_140, %c2_141, %c0_142] : memref<6x3x32xf32, #tpu.memory_space<vmem>>, vector<1x1x32xf32>
    %341 = vector.shape_cast %340 : vector<1x1x32xf32> to vector<32xf32>
    %342 = vector.shape_cast %341 : vector<32xf32> to vector<1x32xf32>
    %343 = vector.broadcast %342 : vector<1x32xf32> to vector<16x32xf32>
    %344 = arith.addf %339, %343 : vector<16x32xf32>
    %345 = arith.addf %285, %344 : vector<16x32xf32>
    %c1_143 = arith.constant 1 : index
    %c2_144 = arith.constant 2 : index
    %c0_145 = arith.constant 0 : index
    %346 = vector.load %arg7[%c1_143, %c2_144, %c0_145] : memref<6x3x32xf32, #tpu.memory_space<vmem>>, vector<1x1x32xf32>
    %347 = vector.shape_cast %346 : vector<1x1x32xf32> to vector<32xf32>
    %c2_146 = arith.constant 2 : index
    %c2_147 = arith.constant 2 : index
    %c0_148 = arith.constant 0 : index
    %348 = vector.load %arg7[%c2_146, %c2_147, %c0_148] : memref<6x3x32xf32, #tpu.memory_space<vmem>>, vector<1x1x32xf32>
    %349 = vector.shape_cast %348 : vector<1x1x32xf32> to vector<32xf32>
    %cst_149 = arith.constant dense<0.000000e+00> : vector<16xf32>
    %350 = vector.multi_reduction <add>, %345, %cst_149 [1] : vector<16x32xf32> to vector<16xf32>
    %351 = vector.shape_cast %350 : vector<16xf32> to vector<16x1xf32>
    %cst_150 = arith.constant 3.200000e+01 : f32
    %352 = vector.broadcast %cst_150 : f32 to vector<16x1xf32>
    %353 = arith.divf %351, %352 : vector<16x1xf32>
    %354 = vector.broadcast %353 : vector<16x1xf32> to vector<16x32xf32>
    %355 = arith.subf %345, %354 : vector<16x32xf32>
    %356 = arith.mulf %355, %355 : vector<16x32xf32>
    %cst_151 = arith.constant dense<0.000000e+00> : vector<16xf32>
    %357 = vector.multi_reduction <add>, %356, %cst_151 [1] : vector<16x32xf32> to vector<16xf32>
    %358 = vector.shape_cast %357 : vector<16xf32> to vector<16x1xf32>
    %cst_152 = arith.constant 3.200000e+01 : f32
    %359 = vector.broadcast %cst_152 : f32 to vector<16x1xf32>
    %360 = arith.divf %358, %359 : vector<16x1xf32>
    %361 = vector.broadcast %353 : vector<16x1xf32> to vector<16x32xf32>
    %362 = arith.subf %345, %361 : vector<16x32xf32>
    %cst_153 = arith.constant 9.99999974E-6 : f32
    %363 = vector.broadcast %cst_153 : f32 to vector<16x1xf32>
    %364 = arith.addf %360, %363 : vector<16x1xf32>
    %365 = math.rsqrt %364 : vector<16x1xf32>
    %366 = vector.broadcast %365 : vector<16x1xf32> to vector<16x32xf32>
    %367 = arith.mulf %362, %366 : vector<16x32xf32>
    %368 = vector.shape_cast %347 : vector<32xf32> to vector<1x32xf32>
    %369 = vector.broadcast %368 : vector<1x32xf32> to vector<16x32xf32>
    %370 = arith.mulf %367, %369 : vector<16x32xf32>
    %371 = vector.shape_cast %349 : vector<32xf32> to vector<1x32xf32>
    %372 = vector.broadcast %371 : vector<1x32xf32> to vector<16x32xf32>
    %373 = arith.addf %370, %372 : vector<16x32xf32>
    %c2_154 = arith.constant 2 : index
    %c0_155 = arith.constant 0 : index
    %c0_156 = arith.constant 0 : index
    %374 = vector.load %arg8[%c2_154, %c0_155, %c0_156] : memref<3x32x64xf32, #tpu.memory_space<vmem>>, vector<1x32x64xf32>
    %375 = vector.shape_cast %374 : vector<1x32x64xf32> to vector<32x64xf32>
    %cst_157 = arith.constant dense<0.000000e+00> : vector<16x64xf32>
    %376 = tpu.matmul %373, %375, %cst_157 {dimension_numbers = #tpu.dot_dimension_numbers<[1], [0], [0], [1], [0, 0, 1, 1], [], []>} : vector<16x32xf32>, vector<32x64xf32>, vector<16x64xf32> -> vector<16x64xf32>
    %c2_158 = arith.constant 2 : index
    %c0_159 = arith.constant 0 : index
    %377 = vector.load %arg9[%c2_158, %c0_159] : memref<3x64xf32, #tpu.memory_space<vmem>>, vector<1x64xf32>
    %378 = vector.shape_cast %377 : vector<1x64xf32> to vector<64xf32>
    %379 = vector.shape_cast %378 : vector<64xf32> to vector<1x64xf32>
    %380 = vector.broadcast %379 : vector<1x64xf32> to vector<16x64xf32>
    %381 = arith.addf %376, %380 : vector<16x64xf32>
    %cst_160 = arith.constant 0.000000e+00 : f32
    %382 = vector.broadcast %cst_160 : f32 to vector<16x64xf32>
    %383 = arith.maximumf %381, %382 : vector<16x64xf32>
    %c2_161 = arith.constant 2 : index
    %c0_162 = arith.constant 0 : index
    %c0_163 = arith.constant 0 : index
    %384 = vector.load %arg10[%c2_161, %c0_162, %c0_163] : memref<3x64x32xf32, #tpu.memory_space<vmem>>, vector<1x64x32xf32>
    %385 = vector.shape_cast %384 : vector<1x64x32xf32> to vector<64x32xf32>
    %cst_164 = arith.constant dense<0.000000e+00> : vector<16x32xf32>
    %386 = tpu.matmul %383, %385, %cst_164 {dimension_numbers = #tpu.dot_dimension_numbers<[1], [0], [0], [1], [0, 0, 1, 1], [], []>} : vector<16x64xf32>, vector<64x32xf32>, vector<16x32xf32> -> vector<16x32xf32>
    %c3_165 = arith.constant 3 : index
    %c2_166 = arith.constant 2 : index
    %c0_167 = arith.constant 0 : index
    %387 = vector.load %arg7[%c3_165, %c2_166, %c0_167] : memref<6x3x32xf32, #tpu.memory_space<vmem>>, vector<1x1x32xf32>
    %388 = vector.shape_cast %387 : vector<1x1x32xf32> to vector<32xf32>
    %389 = vector.shape_cast %388 : vector<32xf32> to vector<1x32xf32>
    %390 = vector.broadcast %389 : vector<1x32xf32> to vector<16x32xf32>
    %391 = arith.addf %386, %390 : vector<16x32xf32>
    %392 = arith.addf %373, %391 : vector<16x32xf32>
    %c4_168 = arith.constant 4 : index
    %c2_169 = arith.constant 2 : index
    %c0_170 = arith.constant 0 : index
    %393 = vector.load %arg7[%c4_168, %c2_169, %c0_170] : memref<6x3x32xf32, #tpu.memory_space<vmem>>, vector<1x1x32xf32>
    %394 = vector.shape_cast %393 : vector<1x1x32xf32> to vector<32xf32>
    %c5_171 = arith.constant 5 : index
    %c2_172 = arith.constant 2 : index
    %c0_173 = arith.constant 0 : index
    %395 = vector.load %arg7[%c5_171, %c2_172, %c0_173] : memref<6x3x32xf32, #tpu.memory_space<vmem>>, vector<1x1x32xf32>
    %396 = vector.shape_cast %395 : vector<1x1x32xf32> to vector<32xf32>
    %cst_174 = arith.constant dense<0.000000e+00> : vector<16xf32>
    %397 = vector.multi_reduction <add>, %392, %cst_174 [1] : vector<16x32xf32> to vector<16xf32>
    %398 = vector.shape_cast %397 : vector<16xf32> to vector<16x1xf32>
    %cst_175 = arith.constant 3.200000e+01 : f32
    %399 = vector.broadcast %cst_175 : f32 to vector<16x1xf32>
    %400 = arith.divf %398, %399 : vector<16x1xf32>
    %401 = vector.broadcast %400 : vector<16x1xf32> to vector<16x32xf32>
    %402 = arith.subf %392, %401 : vector<16x32xf32>
    %403 = arith.mulf %402, %402 : vector<16x32xf32>
    %cst_176 = arith.constant dense<0.000000e+00> : vector<16xf32>
    %404 = vector.multi_reduction <add>, %403, %cst_176 [1] : vector<16x32xf32> to vector<16xf32>
    %405 = vector.shape_cast %404 : vector<16xf32> to vector<16x1xf32>
    %cst_177 = arith.constant 3.200000e+01 : f32
    %406 = vector.broadcast %cst_177 : f32 to vector<16x1xf32>
    %407 = arith.divf %405, %406 : vector<16x1xf32>
    %408 = vector.broadcast %400 : vector<16x1xf32> to vector<16x32xf32>
    %409 = arith.subf %392, %408 : vector<16x32xf32>
    %cst_178 = arith.constant 9.99999974E-6 : f32
    %410 = vector.broadcast %cst_178 : f32 to vector<16x1xf32>
    %411 = arith.addf %407, %410 : vector<16x1xf32>
    %412 = math.rsqrt %411 : vector<16x1xf32>
    %413 = vector.broadcast %412 : vector<16x1xf32> to vector<16x32xf32>
    %414 = arith.mulf %409, %413 : vector<16x32xf32>
    %415 = vector.shape_cast %394 : vector<32xf32> to vector<1x32xf32>
    %416 = vector.broadcast %415 : vector<1x32xf32> to vector<16x32xf32>
    %417 = arith.mulf %414, %416 : vector<16x32xf32>
    %418 = vector.shape_cast %396 : vector<32xf32> to vector<1x32xf32>
    %419 = vector.broadcast %418 : vector<1x32xf32> to vector<16x32xf32>
    %420 = arith.addf %417, %419 : vector<16x32xf32>
    %c0_179 = arith.constant 0 : index
    %c0_180 = arith.constant 0 : index
    %421 = vector.load %arg11[%c0_179, %c0_180] : memref<32x2xf32, #tpu.memory_space<vmem>>, vector<32x2xf32>
    %cst_181 = arith.constant dense<0.000000e+00> : vector<16x2xf32>
    %422 = tpu.matmul %420, %421, %cst_181 {dimension_numbers = #tpu.dot_dimension_numbers<[1], [0], [0], [1], [0, 0, 1, 1], [], []>} : vector<16x32xf32>, vector<32x2xf32>, vector<16x2xf32> -> vector<16x2xf32>
    %c0_182 = arith.constant 0 : index
    %c0_183 = arith.constant 0 : index
    %423 = vector.load %arg12[%c0_182, %c0_183] : memref<1x2xf32, #tpu.memory_space<vmem>>, vector<1x2xf32>
    %424 = vector.broadcast %1 : vector<16x1xf32> to vector<16x2xf32>
    %425 = vector.broadcast %423 : vector<1x2xf32> to vector<16x2xf32>
    %426 = arith.mulf %424, %425 : vector<16x2xf32>
    %427 = arith.addf %422, %426 : vector<16x2xf32>
    %c0_184 = arith.constant 0 : index
    %c0_185 = arith.constant 0 : index
    %428 = vector.load %arg13[%c0_184, %c0_185] : memref<1x2xf32, #tpu.memory_space<vmem>>, vector<1x2xf32>
    %429 = vector.broadcast %428 : vector<1x2xf32> to vector<16x2xf32>
    %430 = arith.addf %427, %429 : vector<16x2xf32>
    %431 = arith.negf %430 : vector<16x2xf32>
    %432 = math.exp %431 : vector<16x2xf32>
    %cst_186 = arith.constant 1.000000e+00 : f32
    %433 = vector.broadcast %cst_186 : f32 to vector<16x2xf32>
    %434 = arith.addf %433, %432 : vector<16x2xf32>
    %435 = arith.divf %433, %434 : vector<16x2xf32>
    %c0_187 = arith.constant 0 : index
    %c0_188 = arith.constant 0 : index
    %436 = vector.load %arg14[%c0_187, %c0_188] : memref<16x2xf32, #tpu.memory_space<vmem>>, vector<16x2xf32>
    tpu.vector_store %arg14[%c0_187, %c0_188], %435 {strides = array<i32>} : memref<16x2xf32, #tpu.memory_space<vmem>>, vector<16x2xf32>,
    return
  }
  func.func @transform_0(%arg0: i32) -> (i32, i32) {
    %c0_i32 = arith.constant 0 : i32
    %c0_i32_0 = arith.constant 0 : i32
    return %arg0, %c0_i32 : i32, i32
  }
  func.func @transform_1(%arg0: i32) -> (i32, i32) {
    %c0_i32 = arith.constant 0 : i32
    %c0_i32_0 = arith.constant 0 : i32
    return %arg0, %c0_i32 : i32, i32
  }
  func.func @transform_2(%arg0: i32) -> (i32, i32, i32) {
    %c0_i32 = arith.constant 0 : i32
    %c0_i32_0 = arith.constant 0 : i32
    %c0_i32_1 = arith.constant 0 : i32
    return %arg0, %c0_i32, %c0_i32_0 : i32, i32, i32
  }
  func.func @transform_3(%arg0: i32) -> (i32, i32, i32) {
    %c0_i32 = arith.constant 0 : i32
    %c0_i32_0 = arith.constant 0 : i32
    %c0_i32_1 = arith.constant 0 : i32
    %c0_i32_2 = arith.constant 0 : i32
    return %c0_i32, %c0_i32_0, %c0_i32_1 : i32, i32, i32
  }
  func.func @transform_4(%arg0: i32) -> (i32, i32) {
    %c0_i32 = arith.constant 0 : i32
    %c0_i32_0 = arith.constant 0 : i32
    %c0_i32_1 = arith.constant 0 : i32
    return %c0_i32, %c0_i32_0 : i32, i32
  }
  func.func @transform_5(%arg0: i32) -> (i32, i32, i32) {
    %c0_i32 = arith.constant 0 : i32
    %c0_i32_0 = arith.constant 0 : i32
    %c0_i32_1 = arith.constant 0 : i32
    %c0_i32_2 = arith.constant 0 : i32
    return %c0_i32, %c0_i32_0, %c0_i32_1 : i32, i32, i32
  }
  func.func @transform_6(%arg0: i32) -> (i32, i32, i32) {
    %c0_i32 = arith.constant 0 : i32
    %c0_i32_0 = arith.constant 0 : i32
    %c0_i32_1 = arith.constant 0 : i32
    %c0_i32_2 = arith.constant 0 : i32
    return %c0_i32, %c0_i32_0, %c0_i32_1 : i32, i32, i32
  }
  func.func @transform_7(%arg0: i32) -> (i32, i32, i32) {
    %c0_i32 = arith.constant 0 : i32
    %c0_i32_0 = arith.constant 0 : i32
    %c0_i32_1 = arith.constant 0 : i32
    %c0_i32_2 = arith.constant 0 : i32
    return %c0_i32, %c0_i32_0, %c0_i32_1 : i32, i32, i32
  }
  func.func @transform_8(%arg0: i32) -> (i32, i32) {
    %c0_i32 = arith.constant 0 : i32
    %c0_i32_0 = arith.constant 0 : i32
    %c0_i32_1 = arith.constant 0 : i32
    return %c0_i32, %c0_i32_0 : i32, i32
  }
  func.func @transform_9(%arg0: i32) -> (i32, i32, i32) {
    %c0_i32 = arith.constant 0 : i32
    %c0_i32_0 = arith.constant 0 : i32
    %c0_i32_1 = arith.constant 0 : i32
    %c0_i32_2 = arith.constant 0 : i32
    return %c0_i32, %c0_i32_0, %c0_i32_1 : i32, i32, i32
  }
  func.func @transform_10(%arg0: i32) -> (i32, i32) {
    %c0_i32 = arith.constant 0 : i32
    %c0_i32_0 = arith.constant 0 : i32
    %c0_i32_1 = arith.constant 0 : i32
    return %c0_i32, %c0_i32_0 : i32, i32
  }
  func.func @transform_11(%arg0: i32) -> (i32, i32) {
    %c0_i32 = arith.constant 0 : i32
    %c0_i32_0 = arith.constant 0 : i32
    %c0_i32_1 = arith.constant 0 : i32
    return %c0_i32, %c0_i32_0 : i32, i32
  }
  func.func @transform_12(%arg0: i32) -> (i32, i32) {
    %c0_i32 = arith.constant 0 : i32
    %c0_i32_0 = arith.constant 0 : i32
    %c0_i32_1 = arith.constant 0 : i32
    return %c0_i32, %c0_i32_0 : i32, i32
  }
  func.func @transform_13(%arg0: i32) -> (i32, i32) {
    %c0_i32 = arith.constant 0 : i32
    %c0_i32_0 = arith.constant 0 : i32
    return %arg0, %c0_i32 : i32, i32
  }
}

</mosaic_0001>

<bundles_post_ra>
// kernel: tpu_custom_call.1
= control target key start
LH: loop header
LB: loop body
LE: loop exit
PB: predicated region body
PF: predicated region fallthrough
CT: control target
= control target key end

     0   :  { %vm86_vm0 = vcmask 261120   ;;  %v4385_v8 = vmov 0.0   ;;  %vm4386_vm1 = vmmov 0   ;;  %v4387_v10 = vmov 0   ;;  %s4388_s25 = smov 96   ;;  %s4391_s26 = smov 80   ;;  %s5080_s3 = inlined_call_operand.vmem [shape: f32[3,32,96], index: 3, kind: input, shape index: {}]   ;;  %s5081_s0 = inlined_call_operand.vmem [shape: f32[16,32], index: 0, kind: input, shape index: {}]   ;;  %s5082_s4 = inlined_call_operand.vmem [shape: f32[3,96], index: 4, kind: input, shape index: {}]   ;;  %s5083_s2 = inlined_call_operand.vmem [shape: s32[2,1,1], index: 2, kind: input, shape index: {}]   ;;  %s5084_s5 = inlined_call_operand.vmem [shape: f32[3,32,32], index: 5, kind: input, shape index: {}]   ;;  %s5085_s6 = inlined_call_operand.vmem [shape: f32[6,3,32], index: 6, kind: input, shape index: {}]   ;;  %s5086_s7 = inlined_call_operand.vmem [shape: f32[3,32,64], index: 7, kind: input, shape index: {}]   ;;  %s5087_s9 = inlined_call_operand.vmem [shape: f32[3,64,32], index: 9, kind: input, shape index: {}]   ;;  %s5088_s8 = inlined_call_operand.vmem [shape: f32[3,64], index: 8, kind: input, shape index: {}]   ;;  %s5089_s1 = inlined_call_operand.vmem [shape: f32[16,1], index: 1, kind: input, shape index: {}]   ;;  %s5090_s10 = inlined_call_operand.vmem [shape: f32[32,2], index: 10, kind: input, shape index: {}]   ;;  %s5091_s11 = inlined_call_operand.vmem [shape: f32[1,2], index: 11, kind: input, shape index: {}]   ;;  %s5092_s12 = inlined_call_operand.vmem [shape: f32[1,2], index: 12, kind: input, shape index: {}]   ;;  %s5093_s13 = inlined_call_operand.vmem [shape: f32[16,2], index: 13, kind: output, shape index: {}]  }
   0x1   :  { %v77_v0 = vld [vmem:[%s5080_s3] sm:$0xff]  ;;  %v78_v1 = vld [vmem:[%s5080_s3 + $0x8] sm:$0xff]  ;;  %v79_v2 = vld [vmem:[%s5080_s3 + $0x10] sm:$0xff]  ;;  %3889 = vmatprep.subr.mxu1 %v4385_v8  ;;  %3891 = vmatprep.mubr.msk.f32.mxu1 %vm4386_vm1, %v4385_v8  ;;  %vm171_vm2 = vcmask 130048   ;;  %v48_v19 = vlaneseq  ;;  %v4389_v24 = vmov -1e+30  }
   0x2   :  { %v4165_v3 = vpack.c.bf16 %v78_v1, %v77_v0  ;;  %v80_v4 = vld [vmem:[%s5080_s3 + $0x18] sm:$0xff]  ;;  %v4480_v5 = vld [vmem:[%s5081_s0] sm:$0xff]  ;;  %v4487_v7 = vld [vmem:[%s5081_s0 + $0x8] sm:$0xff]  ;;  %4303 = vset.pattern.permute.xlu1 %v4387_v10  ;;  %4304 = vset.pattern.permute.xlu0 %v4387_v10  ;;  %vm323_vm7 = vcmask 64512   ;;  %s4392_s27 = smov 112   ;;  %s4393_s28 = smov 48  }
   0x3   :  { %v4169_v6 = vpack.c.bf16 %v80_v4, %v79_v2  ;;  %3886 = vmatprep.mubr.msk.f32.mxu0 %vm86_vm0, %v4480_v5  ;;  %v3595_v9 = vld [vmem:[%s5082_s4] ss:$0 sm:$0xff]  ;;  %v3594_v14 = vld [vmem:[%s5083_s2 + $0x1] ss:$0 sm:$0xff]  ;;  %v49_v20 = vshrl.u32 %v48_v19, 7  ;;  %v51_v21 = vand.u32 127, %v48_v19 }
   0x4   :  { %4166 = vmatprep.subr.bf16.mxu0 %v4165_v3  ;;  %v3593_v11 = vld [vmem:[%s5083_s2] ss:$0 sm:$0xff]  ;;  %s4390_s2 = smov 64   ;;  %s4394_s20 = smov 16   ;;  %vm1083_vm9 = vcmask 523264   ;;  %vm3586_vm10 = vcmask 15360  }
   0x5   :  { %4168 = vmatpush3.bf16.msra.mxu0 %v4165_v3  ;;  %64 = vperm.xlu1 %4303, %v3593_v11   ;;  %vm52_vm3 = vcmp.le.s32.totalorder %v51_v21, %v49_v20 }
   0x6   :  { %4170 = vmatprep.subr.bf16.mxu0 %v4169_v6 }
   0x9   :  { %4172 = vmatpush3.bf16.msra.mxu0 %v4169_v6  ;;  %67 = vperm.xlu1 %4303, %v3594_v14  }
   0xa   :  { %3909 = vmatprep.subr.mxu0 %v4385_v8 }
   0xc   :  { %3887 = vmatmul.mubr.msk.f32.vlgmr.msra.gmra.mrb[0].mxu0 %vm86_vm0, %v4487_v7 }
   0xd   :  { %3911 = vmatprep.mubr.msk.f32.mxu0 %vm4386_vm1, %v4385_v8 }
  0x84   :  { %v65_v22 = vpop.permute.xlu1 %64 }
  0x85   :  { %vm69_vm4 = vcmp.lt.s32.totalorder %v51_v21, %v65_v22 }
  0x86   :  { %vm73_vm5 = vmand %vm52_vm3, %vm69_vm4 }
  0x87   :  { %v4526_v25 = vsel %vm73_vm5, 0.0, %v4389_v24 }
  0x88   :  { %v68_v23 = vpop.permute.xlu1 %67 }
  0x89   :  { %vm70_vm6 = vcmp.lt.s32.totalorder %v51_v21, %v68_v23 }
  0x8a   :  { %vm74_vm8 = vmand %vm52_vm3, %vm70_vm6 }
  0x8b   :  { %v4530_v30 = vsel %vm74_vm8, 0.0, %v4389_v24 }
  0xdf   :  { %v3888_v12 = vpop.f32.mrb[0].mxu0 }
  0xe0   :  { %v159_v13 = vpop.f32.mrb[1].mxu0  ;;  %v4510_v16 = vadd.f32 %v3888_v12, %v3595_v9 }
  0xe1   :  { %v4506_v15 = vadd.f32 %v3595_v9, %v159_v13 }
  0xe3   :  { %169 = vrot.lane.b32.xlu0 %v4506_v15, %s4388_s25 }
  0xe7   :  { %247 = vrot.lane.b32.xlu0 %v4510_v16, %s4388_s25 }
 0x155   :  { %v170_v17 = vpop.permute.xlu0 %169 }
 0x156   :  { %3890 = vmatpush3.xpose.msk.msra.mxu1 %vm171_vm2, %v170_v17 }
 0x157   :  { %3894 = vmatprep.subr.mxu1 %v4385_v8 }
 0x159   :  { %3892 = vmatmul.mubr.msk.f32.vlgmr.msra.gmra.mrb[0].mxu1 %vm171_vm2, %v4506_v15  ;;  %v248_v18 = vpop.permute.xlu0 %247 }
 0x15a   :  { %3895 = vmatpush3.xpose.msk.msra.mxu1 %vm171_vm2, %v248_v18  ;;  %3896 = vmatprep.mubr.msk.f32.mxu1 %vm4386_vm1, %v4385_v8 }
 0x15b   :  { %3899 = vmatprep.subr.mxu1 %v4385_v8 }
 0x15d   :  { %3897 = vmatmul.mubr.msk.f32.vlgmr.msra.gmra.mrb[2].mxu1 %vm171_vm2, %v4510_v16 }
 0x15e   :  { %3901 = vmatprep.mubr.msk.f32.mxu1 %vm4386_vm1, %v4385_v8 }
 0x22c   :  { %v242_v26 = vpop.f32.mrb[0].mxu1 }
 0x22d   :  { %v243_v27 = vadd.f32 %v242_v26, %v4526_v25  ;;  %v3893_v28 = vpop.f32.mrb[1].mxu1 }
 0x22e   :  { %v842_v28 = vld [vmem:[%s5084_s5] sm:$0xff] }
 0x22f   :  { %v324_v29 = vsel %vm323_vm7, %v243_v27, -inf }
 0x230   :  { %325 = vmax.xlane.f32.xlu0 %v324_v29  ;;  %v319_v31 = vpop.f32.mrb[2].mxu1  ;;  %v844_v29 = vld [vmem:[%s5084_s5 + $0x10] sm:$0xff] }
 0x231   :  { %v320_v32 = vadd.f32 %v319_v31, %v4530_v30  ;;  %v3898_v33 = vpop.f32.mrb[3].mxu1 }
 0x233   :  { %v327_v34 = vsel %vm323_vm7, %v320_v32, -inf }
 0x234   :  { %328 = vmax.xlane.f32.xlu1 %v327_v34 }
 0x245   :  { %348 = vrot.lane.b32.xlu1 %v4506_v15, %s4390_s2 }
 0x249   :  { %502 = vrot.lane.b32.xlu1 %v4506_v15, %s4391_s26 }
 0x24d   :  { %580 = vrot.lane.b32.xlu1 %v4510_v16, %s4391_s26 }
 0x251   :  { %578 = vrot.lane.b32.xlu1 %v4510_v16, %s4392_s27 }
 0x2bd   :  { %v326_v35 = vpop.xlane.xlu0 %325 }
 0x2be   :  { %v330_v36 = vsub.f32 %v243_v27, %v326_v35 }
 0x2c0   :  { %v332_v37 = vmul.f32 1.442695, %v330_v36 }
 0x2c1   :  { %v329_v38 = vpop.xlane.xlu1 %328 }
 0x2c2   :  { %4305 = vpow2.f32 %v332_v37  ;;  %v331_v43 = vsub.f32 %v320_v32, %v329_v38  ;;  %v845_v32 = vld [vmem:[%s5084_s5 + $0x18] sm:$0xff] }
 0x2c3   :  { %v4177_v33 = vpack.c.bf16 %v845_v32, %v844_v29  ;;  %v1076_v32 = vld [vmem:[%s5087_s9 + $0x38] sm:$0xff] }
 0x2c4   :  { %v334_v44 = vmul.f32 1.442695, %v331_v43 }
 0x2c5   :  { %v349_v39 = vpop.permute.xlu1 %348 }
 0x2c6   :  { %3900 = vmatpush3.msra.mxu1 %v349_v39  ;;  %4307 = vpow2.f32 %v334_v44 }
 0x2c7   :  { %3904 = vmatprep.subr.mxu1 %v4385_v8 }
 0x2c9   :  { %v503_v40 = vpop.permute.xlu1 %502 }
 0x2ca   :  { %3910 = vmatpush3.xpose.msk.msra.mxu0 %vm171_vm2, %v503_v40 }
 0x2cb   :  { %3919 = vmatprep.subr.mxu0 %v4385_v8 }
 0x2cc   :  { %v4306_v41 = vpop.eup %4305 }
 0x2cd   :  { %v336_v42 = vsel %vm323_vm7, %v4306_v41, 0.0  ;;  %v581_v54 = vpop.permute.xlu1 %580 }
 0x2ce   :  { %337 = vadd.xlane.f32.xlu0 %v336_v42  ;;  %v3610_v42 = vld [vmem:[%s5085_s6] ss:$0 sm:$0xff] }
 0x2d0   :  { %v4308_v45 = vpop.eup %4307 }
 0x2d1   :  { %v339_v46 = vsel %vm323_vm7, %v4308_v45, 0.0  ;;  %v579_v56 = vpop.permute.xlu1 %578 }
 0x2e4   :  { %424 = vrot.lane.b32.xlu0 %v4510_v16, %s4390_s2 }
 0x303   :  { %340 = vadd.xlane.f32.xlu0 %v339_v46 }
 0x319   :  { %500 = vrot.lane.b32.xlu0 %v4506_v15, %s4392_s27 }
 0x35b   :  { %v338_v47 = vpop.xlane.xlu0 %337 }
 0x35c   :  { %4309 = vrcp.f32 %v338_v47 }
 0x35f   :  { %v425_v50 = vpop.permute.xlu0 %424 }
 0x366   :  { %v4310_v48 = vpop.eup %4309 }
 0x367   :  { %v346_v49 = vmul.f32 %v4310_v48, %v4306_v41 }
 0x369   :  { %3902 = vmatmul.mubr.msk.f32.vlgmr.msra.gmra.mrb[4].mxu1 %vm323_vm7, %v346_v49 }
 0x36a   :  { %3905 = vmatpush3.msra.mxu1 %v425_v50  ;;  %3906 = vmatprep.mubr.msk.f32.mxu1 %vm4386_vm1, %v4385_v8 }
 0x36b   :  { %3914 = vmatprep.subr.mxu1 %v4385_v8 }
 0x390   :  { %v341_v51 = vpop.xlane.xlu0 %340 }
 0x391   :  { %4311 = vrcp.f32 %v341_v51 }
 0x394   :  { %v501_v52 = vpop.permute.xlu0 %500 }
 0x395   :  { %3912 = vmatmul.mubr.msk.f32.vlgmr.msra.gmra.mrb[2].mxu0 %vm171_vm2, %v501_v52 }
 0x396   :  { %3921 = vmatprep.mubr.msk.f32.mxu0 %vm4386_vm1, %v4385_v8 }
 0x39b   :  { %v4312_v53 = vpop.eup %4311 }
 0x39c   :  { %v347_v55 = vmul.f32 %v4312_v53, %v4308_v45 }
 0x39e   :  { %3907 = vmatmul.mubr.msk.f32.vlgmr.msra.gmra.mrb[6].mxu1 %vm323_vm7, %v347_v55 }
 0x39f   :  { %3915 = vmatpush3.xpose.msk.msra.mxu1 %vm171_vm2, %v581_v54  ;;  %3916 = vmatprep.mubr.msk.f32.mxu1 %vm4386_vm1, %v4385_v8 }
 0x3a0   :  { %3924 = vmatprep.subr.mxu1 %v4385_v8 }
 0x3a2   :  { %3917 = vmatmul.mubr.msk.f32.vlgmr.msra.gmra.mrb[8].mxu1 %vm171_vm2, %v579_v56 }
 0x3a3   :  { %3926 = vmatprep.mubr.msk.f32.mxu1 %vm4386_vm1, %v4385_v8 }
 0x43c   :  { %v4566_v57 = vpop.f32.mrb[4].mxu1 }
 0x43d   :  { %v3903_v58 = vpop.f32.mrb[5].mxu1 }
 0x468   :  { %v574_v59 = vpop.f32.mrb[2].mxu0 }
 0x469   :  { %v575_v60 = vadd.f32 %v574_v59, %v4526_v25  ;;  %v3913_v61 = vpop.f32.mrb[3].mxu0 }
 0x46b   :  { %v656_v62 = vsel %vm323_vm7, %v575_v60, -inf }
 0x46c   :  { %657 = vmax.xlane.f32.xlu0 %v656_v62  ;;  %v979_v62 = vld [vmem:[%s5086_s7 + $0x10] sm:$0xff] }
 0x471   :  { %v496_v63 = vpop.f32.mrb[6].mxu1 }
 0x472   :  { %v3908_v0 = vpop.f32.mrb[7].mxu1 }
 0x475   :  { %v652_v1 = vpop.f32.mrb[8].mxu1 }
 0x476   :  { %v653_v2 = vadd.f32 %v652_v1, %v4530_v30  ;;  %v3918_v3 = vpop.f32.mrb[9].mxu1  ;;  %v1069_v1 = vld [vmem:[%s5087_s9] sm:$0xff] }
 0x477   :  { %v1071_v3 = vld [vmem:[%s5087_s9 + $0x10] sm:$0xff] }
 0x478   :  { %v659_v4 = vsel %vm323_vm7, %v653_v2, -inf }
 0x479   :  { %660 = vmax.xlane.f32.xlu1 %v659_v4 }
 0x48a   :  { %680 = vrot.lane.b32.xlu1 %v4506_v15, %s4393_s28 }
 0x4f9   :  { %v658_v6 = vpop.xlane.xlu0 %657 }
 0x4fa   :  { %v662_v9 = vsub.f32 %v575_v60, %v658_v6  ;;  %v978_v60 = vld [vmem:[%s5086_s7 + $0x8] sm:$0xff]  ;;  %v1072_v6 = vld [vmem:[%s5087_s9 + $0x18] sm:$0xff] }
 0x4fc   :  { %v664_v10 = vmul.f32 1.442695, %v662_v9  ;;  %v4193_v9 = vpack.c.bf16 %v1072_v6, %v1071_v3 }
 0x4fe   :  { %4313 = vpow2.f32 %v664_v10  ;;  %v1073_v10 = vld [vmem:[%s5087_s9 + $0x20] sm:$0xff] }
 0x506   :  { %v661_v11 = vpop.xlane.xlu1 %660 }
 0x507   :  { %v663_v12 = vsub.f32 %v653_v2, %v661_v11  ;;  %v1070_v2 = vld [vmem:[%s5087_s9 + $0x8] sm:$0xff] }
 0x508   :  { %v4314_v13 = vpop.eup %4313  ;;  %v4189_v4 = vpack.c.bf16 %v1070_v2, %v1069_v1  ;;  %v1074_v11 = vld [vmem:[%s5087_s9 + $0x28] sm:$0xff] }
 0x509   :  { %v666_v14 = vmul.f32 1.442695, %v663_v12  ;;  %v668_v17 = vsel %vm323_vm7, %v4314_v13, 0.0  ;;  %v4197_v12 = vpack.c.bf16 %v1074_v11, %v1073_v10  ;;  %v3626_v10 = vld [vmem:[%s5085_s6 + $0x10] ss:$0 sm:$0xff] }
 0x50a   :  { %v681_v18 = vpop.permute.xlu1 %680  ;;  %669 = vadd.xlane.f32.xlu0 %v668_v17 }
 0x50b   :  { %4315 = vpow2.f32 %v666_v14  ;;  %3920 = vmatpush3.msra.mxu0 %v681_v18 }
 0x515   :  { %v4316_v19 = vpop.eup %4315 }
 0x516   :  { %v671_v20 = vsel %vm323_vm7, %v4316_v19, 0.0 }
 0x517   :  { %672 = vadd.xlane.f32.xlu0 %v671_v20 }
 0x52d   :  { %756 = vrot.lane.b32.xlu0 %v4510_v16, %s4393_s28  ;;  %v843_v16 = vld [vmem:[%s5084_s5 + $0x8] sm:$0xff] }
 0x52e   :  { %v4173_v31 = vpack.c.bf16 %v843_v16, %v842_v28 }
 0x530   :  { %4174 = vmatprep.subr.bf16.mxu0 %v4173_v31 }
 0x597   :  { %v670_v15 = vpop.xlane.xlu0 %669 }
 0x598   :  { %4317 = vrcp.f32 %v670_v15 }
 0x5a2   :  { %v4318_v21 = vpop.eup %4317 }
 0x5a3   :  { %v678_v22 = vmul.f32 %v4318_v21, %v4314_v13  ;;  %v3615_v21 = vld [vmem:[%s5085_s6 + $0x4] ss:$0 sm:$0xff] }
 0x5a4   :  { %v673_v23 = vpop.xlane.xlu0 %672 }
 0x5a5   :  { %4319 = vrcp.f32 %v673_v23  ;;  %3922 = vmatmul.mubr.msk.f32.vlgmr.msra.gmra.mrb[4].mxu0 %vm323_vm7, %v678_v22  ;;  %v3616_v23 = vld [vmem:[%s5085_s6 + $0x8] ss:$0 sm:$0xff] }
 0x5a6   :  { %4176 = vmatpush3.bf16.msra.mxu0 %v4173_v31  ;;  %v1075_v31 = vld [vmem:[%s5087_s9 + $0x30] sm:$0xff] }
 0x5a7   :  { %4178 = vmatprep.subr.bf16.mxu0 %v4177_v33 }
 0x5a8   :  { %v757_v24 = vpop.permute.xlu0 %756 }
 0x5a9   :  { %3925 = vmatpush3.msra.mxu1 %v757_v24 }
 0x5aa   :  { %4180 = vmatpush3.bf16.msra.mxu0 %v4177_v33  ;;  %v4201_v33 = vpack.c.bf16 %v1076_v32, %v1075_v31 }
 0x5ab   :  { %4190 = vmatprep.subr.bf16.mxu0 %v4189_v4 }
 0x5af   :  { %v4320_v26 = vpop.eup %4319 }
 0x5b0   :  { %v679_v27 = vmul.f32 %v4320_v26, %v4316_v19 }
 0x5b2   :  { %3927 = vmatmul.mubr.msk.f32.vlgmr.msra.gmra.mrb[10].mxu1 %vm323_vm7, %v679_v27 }
 0x678   :  { %v752_v34 = vpop.f32.mrb[4].mxu0 }
 0x679   :  { %834 = vrot.lane.b32.xlu1 %v752_v34, %s4394_s20  ;;  %v3923_v35 = vpop.f32.mrb[5].mxu0  ;;  %v3617_v34 = vld [vmem:[%s5088_s8] ss:$0 sm:$0xff] }
 0x685   :  { %v828_v36 = vpop.f32.mrb[10].mxu1 }
 0x686   :  { %v3928_v37 = vpop.f32.mrb[11].mxu1  ;;  %836 = vrot.lane.b32.xlu1 %v828_v36, %s4394_s20 }
 0x6eb   :  { %v835_v38 = vpop.permute.xlu1 %834 }
 0x6ec   :  { %v840_v39 = vsel %vm171_vm2, %v4566_v57, %v835_v38 }
 0x6ed   :  { %3937 = vmatprep.mubr.msk.f32.mxu0 %vm86_vm0, %v840_v39 }
 0x6f8   :  { %v837_v40 = vpop.permute.xlu1 %836 }
 0x6f9   :  { %v841_v41 = vsel %vm171_vm2, %v496_v63, %v837_v40  ;;  %v980_v63 = vld [vmem:[%s5086_s7 + $0x18] sm:$0xff] }
 0x6fa   :  { %3938 = vmatmul.mubr.msk.f32.vlgmr.msra.gmra.mrb[6].mxu0 %vm86_vm0, %v841_v41  ;;  %v4185_v0 = vpack.c.bf16 %v980_v63, %v979_v62  ;;  %v3621_v41 = vld [vmem:[%s5085_s6 + $0xc] ss:$0 sm:$0xff]  ;;  %v3631_v62 = vld [vmem:[%s5080_s3 + $0x38] sm:$0xff] }
 0x6fb   :  { %4192 = vmatpush3.bf16.msra.mxu0 %v4189_v4 }
 0x6fc   :  { %4194 = vmatprep.subr.bf16.mxu0 %v4193_v9 }
 0x6ff   :  { %4196 = vmatpush3.bf16.msra.mxu0 %v4193_v9 }
 0x700   :  { %4198 = vmatprep.subr.bf16.mxu0 %v4197_v12 }
 0x703   :  { %4200 = vmatpush3.bf16.msra.mxu0 %v4197_v12 }
 0x704   :  { %4202 = vmatprep.subr.bf16.mxu0 %v4201_v33 }
 0x707   :  { %4204 = vmatpush3.bf16.msra.mxu0 %v4201_v33 }
 0x708   :  { %3991 = vmatprep.subr.mxu0 %v4385_v8 }
 0x7cd   :  { %v3939_v43 = vpop.f32.mrb[6].mxu0 }
 0x7ce   :  { %v929_v44 = vadd.f32 %v3939_v43, %v3610_v42  ;;  %v923_v45 = vpop.f32.mrb[7].mxu0 }
 0x7cf   :  { %v924_v46 = vadd.f32 %v3610_v42, %v923_v45 }
 0x7d0   :  { %v933_v47 = vadd.f32 %v929_v44, %v4487_v7 }
 0x7d1   :  { %v932_v48 = vadd.f32 %v924_v46, %v4480_v5  ;;  %v977_v5 = vld [vmem:[%s5086_s7] sm:$0xff] }
 0x7d2   :  { %v941_v49 = vsel %vm86_vm0, %v933_v47, 0.0  ;;  %v4181_v61 = vpack.c.bf16 %v978_v60, %v977_v5  ;;  %v3629_v5 = vld [vmem:[%s5080_s3 + $0x28] sm:$0xff] }
 0x7d3   :  { %942 = vadd.xlane.f32.xlu1 %v941_v49  ;;  %v938_v50 = vsel %vm86_vm0, %v932_v48, 0.0 }
 0x7d4   :  { %939 = vadd.xlane.f32.xlu0 %v938_v50  ;;  %4182 = vmatprep.subr.bf16.mxu1 %v4181_v61 }
 0x7d5   :  { %4184 = vmatpush3.bf16.msra.mxu1 %v4181_v61  ;;  %v3630_v61 = vld [vmem:[%s5080_s3 + $0x30] sm:$0xff] }
 0x7d6   :  { %4186 = vmatprep.subr.bf16.mxu1 %v4185_v0  ;;  %v4209_v63 = vpack.c.bf16 %v3631_v62, %v3630_v61 }
 0x7d9   :  { %4188 = vmatpush3.bf16.msra.mxu1 %v4185_v0 }
 0x860   :  { %v943_v51 = vpop.xlane.xlu1 %942 }
 0x861   :  { %v946_v52 = vmul.f32 0.03125, %v943_v51  ;;  %v940_v53 = vpop.xlane.xlu0 %939 }
 0x862   :  { %v945_v54 = vmul.f32 0.03125, %v940_v53 }
 0x863   :  { %v948_v55 = vsub.f32 %v933_v47, %v946_v52 }
 0x864   :  { %v947_v56 = vsub.f32 %v932_v48, %v945_v54 }
 0x865   :  { %v950_v59 = vmul.f32 %v948_v55, %v948_v55 }
 0x866   :  { %v949_v57 = vmul.f32 %v947_v56, %v947_v56 }
 0x867   :  { %v954_v7 = vsel %vm86_vm0, %v950_v59, 0.0 }
 0x868   :  { %v951_v58 = vsel %vm86_vm0, %v949_v57, 0.0 }
 0x869   :  { %952 = vadd.xlane.f32.xlu0 %v951_v58 }
 0x86d   :  { %955 = vadd.xlane.f32.xlu0 %v954_v7  ;;  %v3628_v7 = vld [vmem:[%s5080_s3 + $0x20] sm:$0xff] }
 0x86e   :  { %v4205_v60 = vpack.c.bf16 %v3629_v5, %v3628_v7 }
 0x870   :  { %4206 = vmatprep.subr.bf16.mxu1 %v4205_v60 }
 0x8f6   :  { %v953_v13 = vpop.xlane.xlu0 %952 }
 0x8f7   :  { %v957_v14 = vmul.f32 0.03125, %v953_v13 }
 0x8f9   :  { %v959_v17 = vadd.f32 1e-05, %v957_v14  ;;  %v3627_v14 = vld [vmem:[%s5085_s6 + $0x14] ss:$0 sm:$0xff] }
 0x8fa   :  { %v956_v18 = vpop.xlane.xlu0 %955 }
 0x8fb   :  { %4321 = vrsqrt.f32 %v959_v17  ;;  %v958_v19 = vmul.f32 0.03125, %v956_v18 }
 0x8fd   :  { %v960_v20 = vadd.f32 1e-05, %v958_v19 }
 0x8ff   :  { %4323 = vrsqrt.f32 %v960_v20 }
 0x905   :  { %v4322_v15 = vpop.eup %4321 }
 0x906   :  { %v963_v22 = vmul.f32 %v4322_v15, %v947_v56  ;;  %v3632_v15 = vld [vmem:[%s5082_s4 + $0x1] ss:$0 sm:$0xff] }
 0x908   :  { %v969_v24 = vmul.f32 %v3615_v21, %v963_v22 }
 0x909   :  { %v4324_v26 = vpop.eup %4323 }
 0x90a   :  { %v964_v27 = vmul.f32 %v4324_v26, %v948_v55  ;;  %v975_v28 = vadd.f32 %v3616_v23, %v969_v24 }
 0x90c   :  { %v970_v16 = vmul.f32 %v3615_v21, %v964_v27  ;;  %3948 = vmatprep.mubr.msk.f32.mxu1 %vm86_vm0, %v975_v28 }
 0x90e   :  { %v976_v29 = vadd.f32 %v3616_v23, %v970_v16 }
 0x910   :  { %3949 = vmatmul.mubr.msk.f32.vlgmr.msra.gmra.mrb[12].mxu1 %vm86_vm0, %v976_v29 }
 0x911   :  { %4208 = vmatpush3.bf16.msra.mxu1 %v4205_v60 }
 0x912   :  { %4210 = vmatprep.subr.bf16.mxu1 %v4209_v63 }
 0x915   :  { %4212 = vmatpush3.bf16.msra.mxu1 %v4209_v63 }
 0x916   :  { %3981 = vmatprep.subr.mxu1 %v4385_v8 }
 0x9e3   :  { %v3950_v35 = vpop.f32.mrb[12].mxu1 }
 0x9e4   :  { %v1064_v36 = vadd.f32 %v3950_v35, %v3617_v34  ;;  %v1058_v37 = vpop.f32.mrb[13].mxu1 }
 0x9e5   :  { %v1059_v38 = vadd.f32 %v3617_v34, %v1058_v37 }
 0x9e6   :  { %v1068_v40 = vmax.f32 %v1064_v36, 0.0 }
 0x9e7   :  { %v1067_v39 = vmax.f32 %v1059_v38, 0.0 }
 0x9e9   :  { %3967 = vmatprep.mubr.msk.f32.mxu0 %vm1083_vm9, %v1067_v39 }
 0x9ea   :  { %3968 = vmatmul.mubr.msk.f32.vlgmr.msra.gmra.mrb[8].mxu0 %vm1083_vm9, %v1068_v40 }
 0x9eb   :  { %3993 = vmatprep.mubr.msk.f32.mxu0 %vm4386_vm1, %v4385_v8 }
 0xabd   :  { %v3969_v42 = vpop.f32.mrb[8].mxu0 }
 0xabe   :  { %v1162_v43 = vadd.f32 %v3969_v42, %v3621_v41  ;;  %v1156_v44 = vpop.f32.mrb[9].mxu0 }
 0xabf   :  { %v1157_v45 = vadd.f32 %v3621_v41, %v1156_v44 }
 0xac0   :  { %v1166_v46 = vadd.f32 %v1162_v43, %v976_v29 }
 0xac1   :  { %v1165_v47 = vadd.f32 %v1157_v45, %v975_v28 }
 0xac2   :  { %v1174_v48 = vsel %vm86_vm0, %v1166_v46, 0.0 }
 0xac3   :  { %1175 = vadd.xlane.f32.xlu0 %v1174_v48  ;;  %v1171_v49 = vsel %vm86_vm0, %v1165_v47, 0.0 }
 0xac4   :  { %1172 = vadd.xlane.f32.xlu1 %v1171_v49 }
 0xb50   :  { %v1176_v50 = vpop.xlane.xlu0 %1175 }
 0xb51   :  { %v1178_v51 = vmul.f32 0.03125, %v1176_v50  ;;  %v1173_v52 = vpop.xlane.xlu1 %1172 }
 0xb52   :  { %v1177_v53 = vmul.f32 0.03125, %v1173_v52 }
 0xb53   :  { %v1180_v54 = vsub.f32 %v1166_v46, %v1178_v51 }
 0xb54   :  { %v1179_v55 = vsub.f32 %v1165_v47, %v1177_v53 }
 0xb55   :  { %v1182_v56 = vmul.f32 %v1180_v54, %v1180_v54 }
 0xb56   :  { %v1181_v57 = vmul.f32 %v1179_v55, %v1179_v55 }
 0xb57   :  { %v1186_v58 = vsel %vm86_vm0, %v1182_v56, 0.0 }
 0xb58   :  { %1187 = vadd.xlane.f32.xlu0 %v1186_v58  ;;  %v1183_v59 = vsel %vm86_vm0, %v1181_v57, 0.0 }
 0xb59   :  { %1184 = vadd.xlane.f32.xlu1 %v1183_v59 }
 0xbe5   :  { %v1188_v0 = vpop.xlane.xlu0 %1187 }
 0xbe6   :  { %v1190_v1 = vmul.f32 0.03125, %v1188_v0  ;;  %v1185_v2 = vpop.xlane.xlu1 %1184 }
 0xbe7   :  { %v1189_v3 = vmul.f32 0.03125, %v1185_v2 }
 0xbe8   :  { %v1192_v4 = vadd.f32 1e-05, %v1190_v1 }
 0xbe9   :  { %v1191_v6 = vadd.f32 1e-05, %v1189_v3 }
 0xbea   :  { %4325 = vrsqrt.f32 %v1192_v4 }
 0xbeb   :  { %4327 = vrsqrt.f32 %v1191_v6 }
 0xbf4   :  { %v4326_v9 = vpop.eup %4325 }
 0xbf5   :  { %v4328_v11 = vpop.eup %4327  ;;  %v1196_v12 = vmul.f32 %v4326_v9, %v1180_v54 }
 0xbf6   :  { %v1195_v13 = vmul.f32 %v4328_v11, %v1179_v55 }
 0xbf7   :  { %v1202_v17 = vmul.f32 %v3626_v10, %v1196_v12 }
 0xbf8   :  { %v1201_v18 = vmul.f32 %v3626_v10, %v1195_v13 }
 0xbf9   :  { %v4688_v20 = vadd.f32 %v3627_v14, %v1202_v17 }
 0xbfa   :  { %v4686_v19 = vadd.f32 %v3627_v14, %v1201_v18 }
 0xbfc   :  { %3978 = vmatprep.mubr.msk.f32.mxu1 %vm86_vm0, %v4686_v19 }
 0xbfd   :  { %3979 = vmatmul.mubr.msk.f32.vlgmr.msra.gmra.mrb[14].mxu1 %vm86_vm0, %v4688_v20 }
 0xbfe   :  { %3983 = vmatprep.mubr.msk.f32.mxu1 %vm4386_vm1, %v4385_v8 }
 0xcd0   :  { %v3980_v21 = vpop.f32.mrb[14].mxu1 }
 0xcd1   :  { %v4699_v22 = vadd.f32 %v3980_v21, %v3632_v15  ;;  %v1291_v23 = vpop.f32.mrb[15].mxu1 }
 0xcd2   :  { %v4701_v24 = vadd.f32 %v3632_v15, %v1291_v23 }
 0xcd3   :  { %1378 = vrot.lane.b32.xlu0 %v4699_v22, %s4388_s25 }
 0xcd4   :  { %1301 = vrot.lane.b32.xlu1 %v4701_v24, %s4388_s25 }
 0xd45   :  { %v1379_v27 = vpop.permute.xlu0 %1378 }
 0xd46   :  { %v1302_v26 = vpop.permute.xlu1 %1301 }
 0xd47   :  { %3982 = vmatpush3.xpose.msk.msra.mxu1 %vm171_vm2, %v1302_v26 }
 0xd48   :  { %3986 = vmatprep.subr.mxu1 %v4385_v8 }
 0xd4a   :  { %3984 = vmatmul.mubr.msk.f32.vlgmr.msra.gmra.mrb[16].mxu1 %vm171_vm2, %v4701_v24 }
 0xd4b   :  { %3987 = vmatpush3.xpose.msk.msra.mxu1 %vm171_vm2, %v1379_v27  ;;  %3988 = vmatprep.mubr.msk.f32.mxu1 %vm4386_vm1, %v4385_v8 }
 0xd4c   :  { %3996 = vmatprep.subr.mxu1 %v4385_v8 }
 0xd4e   :  { %3989 = vmatmul.mubr.msk.f32.vlgmr.msra.gmra.mrb[18].mxu1 %vm171_vm2, %v4699_v22 }
 0xd4f   :  { %3998 = vmatprep.mubr.msk.f32.mxu1 %vm4386_vm1, %v4385_v8 }
 0xe1d   :  { %v1373_v28 = vpop.f32.mrb[16].mxu1 }
 0xe1e   :  { %v1374_v16 = vadd.f32 %v1373_v28, %v4526_v25  ;;  %v3985_v29 = vpop.f32.mrb[17].mxu1 }
 0xe1f   :  { %v3647_v29 = vld [vmem:[%s5084_s5 + $0x20] sm:$0xff] }
 0xe20   :  { %v1454_v31 = vsel %vm323_vm7, %v1374_v16, -inf }
 0xe21   :  { %1455 = vmax.xlane.f32.xlu1 %v1454_v31  ;;  %v1450_v32 = vpop.f32.mrb[18].mxu1 }
 0xe22   :  { %v1451_v33 = vadd.f32 %v1450_v32, %v4530_v30  ;;  %v3990_v34 = vpop.f32.mrb[19].mxu1  ;;  %v3649_v32 = vld [vmem:[%s5084_s5 + $0x30] sm:$0xff] }
 0xe24   :  { %v1457_v35 = vsel %vm323_vm7, %v1451_v33, -inf }
 0xe25   :  { %1458 = vmax.xlane.f32.xlu0 %v1457_v35 }
 0xe32   :  { %1478 = vrot.lane.b32.xlu1 %v4701_v24, %s4390_s2 }
 0xe36   :  { %1632 = vrot.lane.b32.xlu1 %v4701_v24, %s4391_s26 }
 0xe3a   :  { %1710 = vrot.lane.b32.xlu1 %v4699_v22, %s4391_s26 }
 0xe3b   :  { %1554 = vrot.lane.b32.xlu0 %v4699_v22, %s4390_s2 }
 0xeae   :  { %v1456_v36 = vpop.xlane.xlu1 %1455 }
 0xeaf   :  { %v1460_v37 = vsub.f32 %v1374_v16, %v1456_v36 }
 0xeb1   :  { %v1462_v38 = vmul.f32 1.442695, %v1460_v37 }
 0xeb2   :  { %v1479_v39 = vpop.permute.xlu1 %1478  ;;  %v1459_v40 = vpop.xlane.xlu0 %1458 }
 0xeb3   :  { %4329 = vpow2.f32 %v1462_v38  ;;  %v1461_v41 = vsub.f32 %v1451_v33, %v1459_v40  ;;  %3992 = vmatpush3.msra.mxu0 %v1479_v39  ;;  %v3650_v33 = vld [vmem:[%s5084_s5 + $0x38] sm:$0xff] }
 0xeb4   :  { %4001 = vmatprep.subr.mxu0 %v4385_v8  ;;  %v4217_v34 = vpack.c.bf16 %v3650_v33, %v3649_v32  ;;  %v3671_v32 = vld [vmem:[%s5087_s9 + $0x70] sm:$0xff]  ;;  %v3672_v33 = vld [vmem:[%s5087_s9 + $0x78] sm:$0xff] }
 0xeb5   :  { %v1464_v42 = vmul.f32 1.442695, %v1461_v41 }
 0xeb6   :  { %v1555_v43 = vpop.permute.xlu0 %1554  ;;  %v1633_v48 = vpop.permute.xlu1 %1632 }
 0xeb7   :  { %4331 = vpow2.f32 %v1464_v42  ;;  %3997 = vmatpush3.msra.mxu1 %v1555_v43  ;;  %v3651_v43 = vld [vmem:[%s5085_s6 + $0x1] ss:$0 sm:$0xff] }
 0xeb8   :  { %4006 = vmatprep.subr.mxu1 %v4385_v8 }
 0xeba   :  { %v1711_v49 = vpop.permute.xlu1 %1710 }
 0xebd   :  { %v4330_v44 = vpop.eup %4329 }
 0xebe   :  { %v1466_v45 = vsel %vm323_vm7, %v4330_v44, 0.0 }
 0xebf   :  { %1467 = vadd.xlane.f32.xlu1 %v1466_v45 }
 0xec1   :  { %v4332_v46 = vpop.eup %4331 }
 0xec2   :  { %v1469_v47 = vsel %vm323_vm7, %v4332_v46, 0.0 }
 0xec3   :  { %1470 = vadd.xlane.f32.xlu0 %v1469_v47 }
 0xed0   :  { %1708 = vrot.lane.b32.xlu1 %v4699_v22, %s4392_s27 }
 0xed9   :  { %1630 = vrot.lane.b32.xlu0 %v4701_v24, %s4392_s27 }
 0xf4c   :  { %v1468_v50 = vpop.xlane.xlu1 %1467 }
 0xf4d   :  { %4333 = vrcp.f32 %v1468_v50 }
 0xf50   :  { %v1471_v51 = vpop.xlane.xlu0 %1470  ;;  %v1709_v57 = vpop.permute.xlu1 %1708 }
 0xf51   :  { %4335 = vrcp.f32 %v1471_v51 }
 0xf54   :  { %v1631_v56 = vpop.permute.xlu0 %1630 }
 0xf57   :  { %v4334_v52 = vpop.eup %4333 }
 0xf58   :  { %v1476_v53 = vmul.f32 %v4334_v52, %v4330_v44 }
 0xf5a   :  { %3994 = vmatmul.mubr.msk.f32.vlgmr.msra.gmra.mrb[10].mxu0 %vm323_vm7, %v1476_v53 }
 0xf5b   :  { %v4336_v54 = vpop.eup %4335  ;;  %4002 = vmatpush3.xpose.msk.msra.mxu0 %vm171_vm2, %v1633_v48  ;;  %4003 = vmatprep.mubr.msk.f32.mxu0 %vm4386_vm1, %v4385_v8 }
 0xf5c   :  { %v1477_v55 = vmul.f32 %v4336_v54, %v4332_v46  ;;  %4011 = vmatprep.subr.mxu0 %v4385_v8 }
 0xf5e   :  { %3999 = vmatmul.mubr.msk.f32.vlgmr.msra.gmra.mrb[20].mxu1 %vm323_vm7, %v1477_v55  ;;  %4004 = vmatmul.mubr.msk.f32.vlgmr.msra.gmra.mrb[12].mxu0 %vm171_vm2, %v1631_v56 }
 0xf5f   :  { %4007 = vmatpush3.xpose.msk.msra.mxu1 %vm171_vm2, %v1711_v49  ;;  %4008 = vmatprep.mubr.msk.f32.mxu1 %vm4386_vm1, %v4385_v8 }
 0xf60   :  { %4016 = vmatprep.subr.mxu1 %v4385_v8  ;;  %4013 = vmatprep.mubr.msk.f32.mxu0 %vm4386_vm1, %v4385_v8 }
 0xf62   :  { %4009 = vmatmul.mubr.msk.f32.vlgmr.msra.gmra.mrb[22].mxu1 %vm171_vm2, %v1709_v57 }
 0xf63   :  { %4018 = vmatprep.mubr.msk.f32.mxu1 %vm4386_vm1, %v4385_v8 }
0x102d   :  { %v1550_v58 = vpop.f32.mrb[10].mxu0 }
0x102e   :  { %v3995_v59 = vpop.f32.mrb[11].mxu0 }
0x1031   :  { %v4755_v7 = vpop.f32.mrb[20].mxu1  ;;  %v1704_v5 = vpop.f32.mrb[12].mxu0 }
0x1032   :  { %v1705_v60 = vadd.f32 %v1704_v5, %v4526_v25  ;;  %v4000_v61 = vpop.f32.mrb[21].mxu1  ;;  %v4005_v62 = vpop.f32.mrb[13].mxu0  ;;  %v3659_v5 = vld [vmem:[%s5086_s7 + $0x28] sm:$0xff] }
0x1033   :  { %v3660_v61 = vld [vmem:[%s5086_s7 + $0x30] sm:$0xff]  ;;  %v3661_v62 = vld [vmem:[%s5086_s7 + $0x38] sm:$0xff] }
0x1034   :  { %v1786_v63 = vsel %vm323_vm7, %v1705_v60, -inf }
0x1035   :  { %1787 = vmax.xlane.f32.xlu0 %v1786_v63  ;;  %v1782_v0 = vpop.f32.mrb[22].mxu1  ;;  %v4225_v63 = vpack.c.bf16 %v3661_v62, %v3660_v61  ;;  %v3684_v61 = vld [vmem:[%s5080_s3 + $0x58] sm:$0xff] }
0x1036   :  { %v1783_v1 = vadd.f32 %v1782_v0, %v4530_v30  ;;  %v4010_v2 = vpop.f32.mrb[23].mxu1  ;;  %v3665_v0 = vld [vmem:[%s5087_s9 + $0x40] sm:$0xff] }
0x1037   :  { %v3667_v2 = vld [vmem:[%s5087_s9 + $0x50] sm:$0xff] }
0x1038   :  { %v1789_v3 = vsel %vm323_vm7, %v1783_v1, -inf }
0x1039   :  { %1790 = vmax.xlane.f32.xlu1 %v1789_v3 }
0x104a   :  { %1810 = vrot.lane.b32.xlu1 %v4701_v24, %s4393_s28 }
0x10c2   :  { %v1788_v4 = vpop.xlane.xlu0 %1787 }
0x10c3   :  { %v1792_v6 = vsub.f32 %v1705_v60, %v1788_v4  ;;  %v3668_v4 = vld [vmem:[%s5087_s9 + $0x58] sm:$0xff] }
0x10c5   :  { %v1794_v9 = vmul.f32 1.442695, %v1792_v6  ;;  %v4233_v6 = vpack.c.bf16 %v3668_v4, %v3667_v2 }
0x10c6   :  { %v1791_v10 = vpop.xlane.xlu1 %1790 }
0x10c7   :  { %4337 = vpow2.f32 %v1794_v9  ;;  %v1793_v11 = vsub.f32 %v1783_v1, %v1791_v10  ;;  %v3666_v1 = vld [vmem:[%s5087_s9 + $0x48] sm:$0xff]  ;;  %v3669_v9 = vld [vmem:[%s5087_s9 + $0x60] sm:$0xff] }
0x10c8   :  { %v4229_v3 = vpack.c.bf16 %v3666_v1, %v3665_v0  ;;  %v3670_v10 = vld [vmem:[%s5087_s9 + $0x68] sm:$0xff] }
0x10c9   :  { %v1796_v12 = vmul.f32 1.442695, %v1793_v11  ;;  %v4237_v11 = vpack.c.bf16 %v3670_v10, %v3669_v9  ;;  %v3679_v9 = vld [vmem:[%s5085_s6 + $0x11] ss:$0 sm:$0xff] }
0x10ca   :  { %v1811_v13 = vpop.permute.xlu1 %1810 }
0x10cb   :  { %4339 = vpow2.f32 %v1796_v12  ;;  %4012 = vmatpush3.msra.mxu0 %v1811_v13 }
0x10d1   :  { %v4338_v14 = vpop.eup %4337 }
0x10d2   :  { %v1798_v17 = vsel %vm323_vm7, %v4338_v14, 0.0 }
0x10d3   :  { %1799 = vadd.xlane.f32.xlu0 %v1798_v17 }
0x10d5   :  { %v4340_v18 = vpop.eup %4339 }
0x10d6   :  { %v1801_v15 = vsel %vm323_vm7, %v4340_v18, 0.0 }
0x10d7   :  { %1802 = vadd.xlane.f32.xlu0 %v1801_v15 }
0x10ed   :  { %1886 = vrot.lane.b32.xlu0 %v4699_v22, %s4393_s28  ;;  %v3648_v22 = vld [vmem:[%s5084_s5 + $0x28] sm:$0xff] }
0x10ee   :  { %v4213_v31 = vpack.c.bf16 %v3648_v22, %v3647_v29 }
0x10f0   :  { %4214 = vmatprep.subr.bf16.mxu0 %v4213_v31 }
0x1160   :  { %v1800_v21 = vpop.xlane.xlu0 %1799 }
0x1161   :  { %4341 = vrcp.f32 %v1800_v21 }
0x1164   :  { %v1803_v23 = vpop.xlane.xlu0 %1802 }
0x1165   :  { %4343 = vrcp.f32 %v1803_v23  ;;  %v3656_v23 = vld [vmem:[%s5085_s6 + $0x5] ss:$0 sm:$0xff] }
0x1168   :  { %v1887_v24 = vpop.permute.xlu0 %1886 }
0x1169   :  { %4017 = vmatpush3.msra.mxu1 %v1887_v24 }
0x116b   :  { %v4342_v26 = vpop.eup %4341 }
0x116c   :  { %v1808_v27 = vmul.f32 %v4342_v26, %v4338_v14  ;;  %v3657_v26 = vld [vmem:[%s5085_s6 + $0x9] ss:$0 sm:$0xff] }
0x116e   :  { %4014 = vmatmul.mubr.msk.f32.vlgmr.msra.gmra.mrb[14].mxu0 %vm323_vm7, %v1808_v27 }
0x116f   :  { %v4344_v28 = vpop.eup %4343  ;;  %4216 = vmatpush3.bf16.msra.mxu0 %v4213_v31 }
0x1170   :  { %v1809_v16 = vmul.f32 %v4344_v28, %v4340_v18  ;;  %4218 = vmatprep.subr.bf16.mxu0 %v4217_v34 }
0x1172   :  { %4019 = vmatmul.mubr.msk.f32.vlgmr.msra.gmra.mrb[24].mxu1 %vm323_vm7, %v1809_v16 }
0x1173   :  { %4220 = vmatpush3.bf16.msra.mxu0 %v4217_v34  ;;  %v4241_v34 = vpack.c.bf16 %v3672_v33, %v3671_v32 }
0x1174   :  { %4230 = vmatprep.subr.bf16.mxu0 %v4229_v3 }
0x1241   :  { %v1882_v35 = vpop.f32.mrb[14].mxu0 }
0x1242   :  { %1964 = vrot.lane.b32.xlu1 %v1882_v35, %s4394_s20  ;;  %v4015_v36 = vpop.f32.mrb[15].mxu0  ;;  %v3662_v35 = vld [vmem:[%s5088_s8 + $0x1] ss:$0 sm:$0xff] }
0x1245   :  { %v1958_v37 = vpop.f32.mrb[24].mxu1 }
0x1246   :  { %1966 = vrot.lane.b32.xlu1 %v1958_v37, %s4394_s20  ;;  %v4020_v38 = vpop.f32.mrb[25].mxu1 }
0x12b4   :  { %v1965_v39 = vpop.permute.xlu1 %1964 }
0x12b5   :  { %v1970_v40 = vsel %vm171_vm2, %v1550_v58, %v1965_v39 }
0x12b6   :  { %4029 = vmatprep.mubr.msk.f32.mxu0 %vm86_vm0, %v1970_v40 }
0x12b8   :  { %v1967_v41 = vpop.permute.xlu1 %1966 }
0x12b9   :  { %v1971_v42 = vsel %vm171_vm2, %v4755_v7, %v1967_v41 }
0x12ba   :  { %4030 = vmatmul.mubr.msk.f32.vlgmr.msra.gmra.mrb[16].mxu0 %vm86_vm0, %v1971_v42  ;;  %v3674_v42 = vld [vmem:[%s5085_s6 + $0xd] ss:$0 sm:$0xff] }
0x12bb   :  { %4232 = vmatpush3.bf16.msra.mxu0 %v4229_v3 }
0x12bc   :  { %4234 = vmatprep.subr.bf16.mxu0 %v4233_v6 }
0x12bf   :  { %4236 = vmatpush3.bf16.msra.mxu0 %v4233_v6 }
0x12c0   :  { %4238 = vmatprep.subr.bf16.mxu0 %v4237_v11 }
0x12c3   :  { %4240 = vmatpush3.bf16.msra.mxu0 %v4237_v11 }
0x12c4   :  { %4242 = vmatprep.subr.bf16.mxu0 %v4241_v34 }
0x12c7   :  { %4244 = vmatpush3.bf16.msra.mxu0 %v4241_v34 }
0x12c8   :  { %4083 = vmatprep.subr.mxu0 %v4385_v8 }
0x138d   :  { %v4031_v44 = vpop.f32.mrb[16].mxu0 }
0x138e   :  { %v2060_v45 = vadd.f32 %v4031_v44, %v3651_v43  ;;  %v2054_v46 = vpop.f32.mrb[17].mxu0 }
0x138f   :  { %v2055_v47 = vadd.f32 %v3651_v43, %v2054_v46 }
0x1390   :  { %v2064_v48 = vadd.f32 %v2060_v45, %v4688_v20 }
0x1391   :  { %v2063_v49 = vadd.f32 %v2055_v47, %v4686_v19  ;;  %v3658_v19 = vld [vmem:[%s5086_s7 + $0x20] sm:$0xff] }
0x1392   :  { %v2070_v50 = vsel %vm86_vm0, %v2064_v48, 0.0  ;;  %v4221_v60 = vpack.c.bf16 %v3659_v5, %v3658_v19  ;;  %v3682_v19 = vld [vmem:[%s5080_s3 + $0x48] sm:$0xff] }
0x1393   :  { %2071 = vadd.xlane.f32.xlu1 %v2070_v50  ;;  %v2067_v51 = vsel %vm86_vm0, %v2063_v49, 0.0 }
0x1394   :  { %2068 = vadd.xlane.f32.xlu0 %v2067_v51  ;;  %4222 = vmatprep.subr.bf16.mxu1 %v4221_v60 }
0x1395   :  { %4224 = vmatpush3.bf16.msra.mxu1 %v4221_v60  ;;  %v3683_v60 = vld [vmem:[%s5080_s3 + $0x50] sm:$0xff] }
0x1396   :  { %4226 = vmatprep.subr.bf16.mxu1 %v4225_v63  ;;  %v4249_v62 = vpack.c.bf16 %v3684_v61, %v3683_v60 }
0x1399   :  { %4228 = vmatpush3.bf16.msra.mxu1 %v4225_v63 }
0x1420   :  { %v2072_v52 = vpop.xlane.xlu1 %2071 }
0x1421   :  { %v2074_v53 = vmul.f32 0.03125, %v2072_v52  ;;  %v2069_v54 = vpop.xlane.xlu0 %2068 }
0x1422   :  { %v2073_v55 = vmul.f32 0.03125, %v2069_v54 }
0x1423   :  { %v2076_v56 = vsub.f32 %v2064_v48, %v2074_v53 }
0x1424   :  { %v2075_v57 = vsub.f32 %v2063_v49, %v2073_v55 }
0x1425   :  { %v2078_v7 = vmul.f32 %v2076_v56, %v2076_v56 }
0x1426   :  { %v2077_v58 = vmul.f32 %v2075_v57, %v2075_v57 }
0x1427   :  { %v2082_v20 = vsel %vm86_vm0, %v2078_v7, 0.0 }
0x1428   :  { %v2079_v59 = vsel %vm86_vm0, %v2077_v58, 0.0 }
0x1429   :  { %2080 = vadd.xlane.f32.xlu0 %v2079_v59 }
0x142d   :  { %2083 = vadd.xlane.f32.xlu0 %v2082_v20  ;;  %v3681_v20 = vld [vmem:[%s5080_s3 + $0x40] sm:$0xff] }
0x142e   :  { %v4245_v5 = vpack.c.bf16 %v3682_v19, %v3681_v20 }
0x1430   :  { %4246 = vmatprep.subr.bf16.mxu1 %v4245_v5 }
0x14b6   :  { %v2081_v12 = vpop.xlane.xlu0 %2080 }
0x14b7   :  { %v2085_v13 = vmul.f32 0.03125, %v2081_v12 }
0x14b9   :  { %v2087_v14 = vadd.f32 1e-05, %v2085_v13  ;;  %v3680_v13 = vld [vmem:[%s5085_s6 + $0x15] ss:$0 sm:$0xff] }
0x14ba   :  { %v2084_v17 = vpop.xlane.xlu0 %2083 }
0x14bb   :  { %4345 = vrsqrt.f32 %v2087_v14  ;;  %v2086_v18 = vmul.f32 0.03125, %v2084_v17 }
0x14bd   :  { %v2088_v15 = vadd.f32 1e-05, %v2086_v18 }
0x14bf   :  { %4347 = vrsqrt.f32 %v2088_v15 }
0x14c5   :  { %v4346_v21 = vpop.eup %4345 }
0x14c6   :  { %v2091_v24 = vmul.f32 %v4346_v21, %v2075_v57  ;;  %v3685_v21 = vld [vmem:[%s5082_s4 + $0x2] ss:$0 sm:$0xff] }
0x14c8   :  { %v2097_v27 = vmul.f32 %v3656_v23, %v2091_v24 }
0x14c9   :  { %v4348_v28 = vpop.eup %4347 }
0x14ca   :  { %v2092_v16 = vmul.f32 %v4348_v28, %v2076_v56  ;;  %v2103_v29 = vadd.f32 %v3657_v26, %v2097_v27 }
0x14cc   :  { %v2098_v22 = vmul.f32 %v3656_v23, %v2092_v16  ;;  %4040 = vmatprep.mubr.msk.f32.mxu1 %vm86_vm0, %v2103_v29 }
0x14ce   :  { %v2104_v31 = vadd.f32 %v3657_v26, %v2098_v22 }
0x14d0   :  { %4041 = vmatmul.mubr.msk.f32.vlgmr.msra.gmra.mrb[26].mxu1 %vm86_vm0, %v2104_v31 }
0x14d1   :  { %4248 = vmatpush3.bf16.msra.mxu1 %v4245_v5 }
0x14d2   :  { %4250 = vmatprep.subr.bf16.mxu1 %v4249_v62 }
0x14d5   :  { %4252 = vmatpush3.bf16.msra.mxu1 %v4249_v62 }
0x14d6   :  { %4073 = vmatprep.subr.mxu1 %v4385_v8 }
0x15a3   :  { %v4042_v36 = vpop.f32.mrb[26].mxu1 }
0x15a4   :  { %v2193_v37 = vadd.f32 %v4042_v36, %v3662_v35  ;;  %v2187_v38 = vpop.f32.mrb[27].mxu1 }
0x15a5   :  { %v2188_v39 = vadd.f32 %v3662_v35, %v2187_v38 }
0x15a6   :  { %v2197_v41 = vmax.f32 %v2193_v37, 0.0 }
0x15a7   :  { %v2196_v40 = vmax.f32 %v2188_v39, 0.0 }
0x15a9   :  { %4059 = vmatprep.mubr.msk.f32.mxu0 %vm1083_vm9, %v2196_v40 }
0x15aa   :  { %4060 = vmatmul.mubr.msk.f32.vlgmr.msra.gmra.mrb[18].mxu0 %vm1083_vm9, %v2197_v41 }
0x15ab   :  { %4085 = vmatprep.mubr.msk.f32.mxu0 %vm4386_vm1, %v4385_v8 }
0x167d   :  { %v4061_v43 = vpop.f32.mrb[18].mxu0 }
0x167e   :  { %v2290_v44 = vadd.f32 %v4061_v43, %v3674_v42  ;;  %v2284_v45 = vpop.f32.mrb[19].mxu0 }
0x167f   :  { %v2285_v46 = vadd.f32 %v3674_v42, %v2284_v45 }
0x1680   :  { %v2294_v47 = vadd.f32 %v2290_v44, %v2104_v31 }
0x1681   :  { %v2293_v48 = vadd.f32 %v2285_v46, %v2103_v29 }
0x1682   :  { %v2300_v49 = vsel %vm86_vm0, %v2294_v47, 0.0 }
0x1683   :  { %2301 = vadd.xlane.f32.xlu0 %v2300_v49  ;;  %v2297_v50 = vsel %vm86_vm0, %v2293_v48, 0.0 }
0x1684   :  { %2298 = vadd.xlane.f32.xlu1 %v2297_v50 }
0x1710   :  { %v2302_v51 = vpop.xlane.xlu0 %2301 }
0x1711   :  { %v2304_v52 = vmul.f32 0.03125, %v2302_v51  ;;  %v2299_v53 = vpop.xlane.xlu1 %2298 }
0x1712   :  { %v2303_v54 = vmul.f32 0.03125, %v2299_v53 }
0x1713   :  { %v2306_v55 = vsub.f32 %v2294_v47, %v2304_v52 }
0x1714   :  { %v2305_v56 = vsub.f32 %v2293_v48, %v2303_v54 }
0x1715   :  { %v2308_v57 = vmul.f32 %v2306_v55, %v2306_v55 }
0x1716   :  { %v2307_v58 = vmul.f32 %v2305_v56, %v2305_v56 }
0x1717   :  { %v2312_v59 = vsel %vm86_vm0, %v2308_v57, 0.0 }
0x1718   :  { %2313 = vadd.xlane.f32.xlu0 %v2312_v59  ;;  %v2309_v7 = vsel %vm86_vm0, %v2307_v58, 0.0 }
0x1719   :  { %2310 = vadd.xlane.f32.xlu1 %v2309_v7 }
0x17a5   :  { %v2314_v63 = vpop.xlane.xlu0 %2313 }
0x17a6   :  { %v2316_v0 = vmul.f32 0.03125, %v2314_v63  ;;  %v2311_v1 = vpop.xlane.xlu1 %2310 }
0x17a7   :  { %v2315_v2 = vmul.f32 0.03125, %v2311_v1 }
0x17a8   :  { %v2318_v3 = vadd.f32 1e-05, %v2316_v0 }
0x17a9   :  { %v2317_v4 = vadd.f32 1e-05, %v2315_v2 }
0x17aa   :  { %4349 = vrsqrt.f32 %v2318_v3 }
0x17ab   :  { %4351 = vrsqrt.f32 %v2317_v4 }
0x17b4   :  { %v4350_v6 = vpop.eup %4349 }
0x17b5   :  { %v4352_v10 = vpop.eup %4351  ;;  %v2322_v11 = vmul.f32 %v4350_v6, %v2306_v55 }
0x17b6   :  { %v2321_v12 = vmul.f32 %v4352_v10, %v2305_v56 }
0x17b7   :  { %v2328_v14 = vmul.f32 %v3679_v9, %v2322_v11 }
0x17b8   :  { %v2327_v17 = vmul.f32 %v3679_v9, %v2321_v12 }
0x17b9   :  { %v4877_v15 = vadd.f32 %v3680_v13, %v2328_v14 }
0x17ba   :  { %v4875_v18 = vadd.f32 %v3680_v13, %v2327_v17 }
0x17bc   :  { %4070 = vmatprep.mubr.msk.f32.mxu1 %vm86_vm0, %v4875_v18 }
0x17bd   :  { %4071 = vmatmul.mubr.msk.f32.vlgmr.msra.gmra.mrb[28].mxu1 %vm86_vm0, %v4877_v15 }
0x17be   :  { %4075 = vmatprep.mubr.msk.f32.mxu1 %vm4386_vm1, %v4385_v8 }
0x1890   :  { %v4072_v23 = vpop.f32.mrb[28].mxu1 }
0x1891   :  { %v4888_v24 = vadd.f32 %v4072_v23, %v3685_v21  ;;  %v2417_v26 = vpop.f32.mrb[29].mxu1 }
0x1892   :  { %v4890_v27 = vadd.f32 %v3685_v21, %v2417_v26 }
0x1893   :  { %2504 = vrot.lane.b32.xlu0 %v4888_v24, %s4388_s25 }
0x1894   :  { %2427 = vrot.lane.b32.xlu1 %v4890_v27, %s4388_s25 }
0x1905   :  { %v2505_v16 = vpop.permute.xlu0 %2504 }
0x1906   :  { %v2428_v28 = vpop.permute.xlu1 %2427 }
0x1907   :  { %4074 = vmatpush3.xpose.msk.msra.mxu1 %vm171_vm2, %v2428_v28 }
0x1908   :  { %4078 = vmatprep.subr.mxu1 %v4385_v8 }
0x190a   :  { %4076 = vmatmul.mubr.msk.f32.vlgmr.msra.gmra.mrb[30].mxu1 %vm171_vm2, %v4890_v27 }
0x190b   :  { %4079 = vmatpush3.xpose.msk.msra.mxu1 %vm171_vm2, %v2505_v16  ;;  %4080 = vmatprep.mubr.msk.f32.mxu1 %vm4386_vm1, %v4385_v8  ;;  %v3700_v16 = vld [vmem:[%s5084_s5 + $0x40] sm:$0xff] }
0x190c   :  { %4088 = vmatprep.subr.mxu1 %v4385_v8 }
0x190e   :  { %4081 = vmatmul.mubr.msk.f32.vlgmr.msra.gmra.mrb[32].mxu1 %vm171_vm2, %v4888_v24 }
0x190f   :  { %4090 = vmatprep.mubr.msk.f32.mxu1 %vm4386_vm1, %v4385_v8 }
0x19dd   :  { %v2499_v29 = vpop.f32.mrb[30].mxu1 }
0x19de   :  { %v2500_v22 = vadd.f32 %v2499_v29, %v4526_v25  ;;  %v4077_v31 = vpop.f32.mrb[31].mxu1 }
0x19df   :  { %v3703_v31 = vld [vmem:[%s5084_s5 + $0x58] sm:$0xff] }
0x19e0   :  { %v2580_v32 = vsel %vm323_vm7, %v2500_v22, -inf }
0x19e1   :  { %2581 = vmax.xlane.f32.xlu1 %v2580_v32  ;;  %v2576_v33 = vpop.f32.mrb[32].mxu1 }
0x19e2   :  { %v2577_v34 = vadd.f32 %v2576_v33, %v4530_v30  ;;  %v4082_v35 = vpop.f32.mrb[33].mxu1 }
0x19e4   :  { %v2583_v36 = vsel %vm323_vm7, %v2577_v34, -inf }
0x19e5   :  { %2584 = vmax.xlane.f32.xlu0 %v2583_v36 }
0x19f2   :  { %2604 = vrot.lane.b32.xlu1 %v4890_v27, %s4390_s2 }
0x19f6   :  { %2758 = vrot.lane.b32.xlu1 %v4890_v27, %s4391_s26 }
0x19fa   :  { %2836 = vrot.lane.b32.xlu1 %v4888_v24, %s4391_s26 }
0x19fb   :  { %2680 = vrot.lane.b32.xlu0 %v4888_v24, %s4390_s2 }
0x1a6e   :  { %v2582_v37 = vpop.xlane.xlu1 %2581 }
0x1a6f   :  { %v2586_v38 = vsub.f32 %v2500_v22, %v2582_v37  ;;  %v3702_v22 = vld [vmem:[%s5084_s5 + $0x50] sm:$0xff] }
0x1a70   :  { %v4257_v32 = vpack.c.bf16 %v3703_v31, %v3702_v22  ;;  %v3715_v22 = vld [vmem:[%s5088_s8 + $0x2] ss:$0 sm:$0xff] }
0x1a71   :  { %v2588_v39 = vmul.f32 1.442695, %v2586_v38 }
0x1a72   :  { %v2605_v40 = vpop.permute.xlu1 %2604  ;;  %v2585_v41 = vpop.xlane.xlu0 %2584 }
0x1a73   :  { %4353 = vpow2.f32 %v2588_v39  ;;  %v2587_v42 = vsub.f32 %v2577_v34, %v2585_v41  ;;  %4084 = vmatpush3.msra.mxu0 %v2605_v40  ;;  %v3704_v41 = vld [vmem:[%s5085_s6 + $0x2] ss:$0 sm:$0xff] }
0x1a74   :  { %4093 = vmatprep.subr.mxu0 %v4385_v8 }
0x1a75   :  { %v2590_v43 = vmul.f32 1.442695, %v2587_v42 }
0x1a76   :  { %v2681_v44 = vpop.permute.xlu0 %2680  ;;  %v2759_v49 = vpop.permute.xlu1 %2758 }
0x1a77   :  { %4355 = vpow2.f32 %v2590_v43  ;;  %4089 = vmatpush3.msra.mxu1 %v2681_v44 }
0x1a78   :  { %4098 = vmatprep.subr.mxu1 %v4385_v8 }
0x1a7a   :  { %v2837_v50 = vpop.permute.xlu1 %2836 }
0x1a7d   :  { %v4354_v45 = vpop.eup %4353 }
0x1a7e   :  { %v2592_v46 = vsel %vm323_vm7, %v4354_v45, 0.0 }
0x1a7f   :  { %2593 = vadd.xlane.f32.xlu1 %v2592_v46 }
0x1a81   :  { %v4356_v47 = vpop.eup %4355 }
0x1a82   :  { %v2595_v48 = vsel %vm323_vm7, %v4356_v47, 0.0 }
0x1a83   :  { %2596 = vadd.xlane.f32.xlu0 %v2595_v48 }
0x1a90   :  { %2834 = vrot.lane.b32.xlu1 %v4888_v24, %s4392_s27 }
0x1a99   :  { %2756 = vrot.lane.b32.xlu0 %v4890_v27, %s4392_s27 }
0x1b0c   :  { %v2594_v51 = vpop.xlane.xlu1 %2593 }
0x1b0d   :  { %4357 = vrcp.f32 %v2594_v51 }
0x1b10   :  { %v2597_v52 = vpop.xlane.xlu0 %2596  ;;  %v2835_v58 = vpop.permute.xlu1 %2834 }
0x1b11   :  { %4359 = vrcp.f32 %v2597_v52 }
0x1b14   :  { %v2757_v57 = vpop.permute.xlu0 %2756 }
0x1b17   :  { %v4358_v53 = vpop.eup %4357 }
0x1b18   :  { %v2602_v54 = vmul.f32 %v4358_v53, %v4354_v45 }
0x1b1a   :  { %4086 = vmatmul.mubr.msk.f32.vlgmr.msra.gmra.mrb[20].mxu0 %vm323_vm7, %v2602_v54 }
0x1b1b   :  { %v4360_v55 = vpop.eup %4359  ;;  %4094 = vmatpush3.xpose.msk.msra.mxu0 %vm171_vm2, %v2759_v49  ;;  %4095 = vmatprep.mubr.msk.f32.mxu0 %vm4386_vm1, %v4385_v8 }
0x1b1c   :  { %v2603_v56 = vmul.f32 %v4360_v55, %v4356_v47  ;;  %4103 = vmatprep.subr.mxu0 %v4385_v8 }
0x1b1e   :  { %4091 = vmatmul.mubr.msk.f32.vlgmr.msra.gmra.mrb[34].mxu1 %vm323_vm7, %v2603_v56  ;;  %4096 = vmatmul.mubr.msk.f32.vlgmr.msra.gmra.mrb[22].mxu0 %vm171_vm2, %v2757_v57 }
0x1b1f   :  { %4099 = vmatpush3.xpose.msk.msra.mxu1 %vm171_vm2, %v2837_v50  ;;  %4100 = vmatprep.mubr.msk.f32.mxu1 %vm4386_vm1, %v4385_v8 }
0x1b20   :  { %4108 = vmatprep.subr.mxu1 %v4385_v8  ;;  %4105 = vmatprep.mubr.msk.f32.mxu0 %vm4386_vm1, %v4385_v8 }
0x1b22   :  { %4101 = vmatmul.mubr.msk.f32.vlgmr.msra.gmra.mrb[36].mxu1 %vm171_vm2, %v2835_v58 }
0x1b23   :  { %4110 = vmatprep.mubr.msk.f32.mxu1 %vm4386_vm1, %v4385_v8 }
0x1bed   :  { %v2676_v59 = vpop.f32.mrb[20].mxu0 }
0x1bee   :  { %v4087_v7 = vpop.f32.mrb[21].mxu0 }
0x1bf1   :  { %v4944_v20 = vpop.f32.mrb[34].mxu1  ;;  %v2830_v19 = vpop.f32.mrb[22].mxu0 }
0x1bf2   :  { %v2831_v5 = vadd.f32 %v2830_v19, %v4526_v25  ;;  %v4092_v60 = vpop.f32.mrb[35].mxu1  ;;  %v4097_v61 = vpop.f32.mrb[23].mxu0  ;;  %v3714_v19 = vld [vmem:[%s5086_s7 + $0x58] sm:$0xff] }
0x1bf3   :  { %v3718_v60 = vld [vmem:[%s5087_s9 + $0x80] sm:$0xff]  ;;  %v3719_v61 = vld [vmem:[%s5087_s9 + $0x88] sm:$0xff] }
0x1bf4   :  { %v2912_v62 = vsel %vm323_vm7, %v2831_v5, -inf }
0x1bf5   :  { %2913 = vmax.xlane.f32.xlu0 %v2912_v62  ;;  %v2908_v63 = vpop.f32.mrb[36].mxu1  ;;  %v3720_v62 = vld [vmem:[%s5087_s9 + $0x90] sm:$0xff] }
0x1bf6   :  { %v2909_v0 = vadd.f32 %v2908_v63, %v4530_v30  ;;  %v4102_v1 = vpop.f32.mrb[37].mxu1  ;;  %v4269_v63 = vpack.c.bf16 %v3719_v61, %v3718_v60 }
0x1bf8   :  { %v2915_v2 = vsel %vm323_vm7, %v2909_v0, -inf }
0x1bf9   :  { %2916 = vmax.xlane.f32.xlu1 %v2915_v2  ;;  %v3722_v2 = vld [vmem:[%s5087_s9 + $0xa0] sm:$0xff] }
0x1c0a   :  { %2936 = vrot.lane.b32.xlu1 %v4890_v27, %s4393_s28 }
0x1c82   :  { %v2914_v8 = vpop.xlane.xlu0 %2913 }
0x1c83   :  { %v2918_v3 = vsub.f32 %v2831_v5, %v2914_v8  ;;  %v3723_v8 = vld [vmem:[%s5087_s9 + $0xa8] sm:$0xff] }
0x1c85   :  { %v2920_v4 = vmul.f32 1.442695, %v2918_v3  ;;  %v4277_v3 = vpack.c.bf16 %v3723_v8, %v3722_v2 }
0x1c86   :  { %v2917_v6 = vpop.xlane.xlu1 %2916 }
0x1c87   :  { %4361 = vpow2.f32 %v2920_v4  ;;  %v2919_v25 = vsub.f32 %v2909_v0, %v2917_v6  ;;  %v3721_v0 = vld [vmem:[%s5087_s9 + $0x98] sm:$0xff] }
0x1c88   :  { %v4273_v1 = vpack.c.bf16 %v3721_v0, %v3720_v62 }
0x1c89   :  { %v2922_v9 = vmul.f32 1.442695, %v2919_v25 }
0x1c8a   :  { %v2937_v10 = vpop.permute.xlu1 %2936 }
0x1c8b   :  { %4363 = vpow2.f32 %v2922_v9  ;;  %4104 = vmatpush3.msra.mxu0 %v2937_v10 }
0x1c91   :  { %v4362_v11 = vpop.eup %4361 }
0x1c92   :  { %v2924_v30 = vsel %vm323_vm7, %v4362_v11, 0.0 }
0x1c93   :  { %2925 = vadd.xlane.f32.xlu0 %v2924_v30 }
0x1c95   :  { %v4364_v12 = vpop.eup %4363 }
0x1c96   :  { %v2927_v13 = vsel %vm323_vm7, %v4364_v12, 0.0 }
0x1c97   :  { %2928 = vadd.xlane.f32.xlu0 %v2927_v13 }
0x1cad   :  { %3012 = vrot.lane.b32.xlu0 %v4888_v24, %s4393_s28  ;;  %v3701_v24 = vld [vmem:[%s5084_s5 + $0x48] sm:$0xff] }
0x1cae   :  { %v4253_v29 = vpack.c.bf16 %v3701_v24, %v3700_v16  ;;  %v3724_v16 = vld [vmem:[%s5087_s9 + $0xb0] sm:$0xff]  ;;  %v3725_v24 = vld [vmem:[%s5087_s9 + $0xb8] sm:$0xff] }
0x1cb0   :  { %4254 = vmatprep.subr.bf16.mxu0 %v4253_v29 }
0x1d20   :  { %v2926_v14 = vpop.xlane.xlu0 %2925 }
0x1d21   :  { %4365 = vrcp.f32 %v2926_v14  ;;  %v3710_v14 = vld [vmem:[%s5085_s6 + $0xa] ss:$0 sm:$0xff] }
0x1d24   :  { %v2929_v17 = vpop.xlane.xlu0 %2928 }
0x1d25   :  { %4367 = vrcp.f32 %v2929_v17 }
0x1d28   :  { %v3013_v21 = vpop.permute.xlu0 %3012 }
0x1d29   :  { %4109 = vmatpush3.msra.mxu1 %v3013_v21 }
0x1d2b   :  { %v4366_v23 = vpop.eup %4365 }
0x1d2c   :  { %v2934_v26 = vmul.f32 %v4366_v23, %v4362_v11 }
0x1d2e   :  { %4106 = vmatmul.mubr.msk.f32.vlgmr.msra.gmra.mrb[24].mxu0 %vm323_vm7, %v2934_v26 }
0x1d2f   :  { %v4368_v27 = vpop.eup %4367  ;;  %4256 = vmatpush3.bf16.msra.mxu0 %v4253_v29  ;;  %v4281_v29 = vpack.c.bf16 %v3725_v24, %v3724_v16 }
0x1d30   :  { %v2935_v28 = vmul.f32 %v4368_v27, %v4364_v12  ;;  %4258 = vmatprep.subr.bf16.mxu0 %v4257_v32  ;;  %v3709_v12 = vld [vmem:[%s5085_s6 + $0x6] ss:$0 sm:$0xff] }
0x1d32   :  { %4111 = vmatmul.mubr.msk.f32.vlgmr.msra.gmra.mrb[38].mxu1 %vm323_vm7, %v2935_v28 }
0x1d33   :  { %4260 = vmatpush3.bf16.msra.mxu0 %v4257_v32 }
0x1d34   :  { %4270 = vmatprep.subr.bf16.mxu0 %v4269_v63 }
0x1e01   :  { %v3008_v33 = vpop.f32.mrb[24].mxu0 }
0x1e02   :  { %3090 = vrot.lane.b32.xlu1 %v3008_v33, %s4394_s20  ;;  %v4107_v34 = vpop.f32.mrb[25].mxu0 }
0x1e05   :  { %v3084_v35 = vpop.f32.mrb[38].mxu1 }
0x1e06   :  { %3092 = vrot.lane.b32.xlu1 %v3084_v35, %s4394_s20  ;;  %v4112_v36 = vpop.f32.mrb[39].mxu1 }
0x1e74   :  { %v3091_v37 = vpop.permute.xlu1 %3090 }
0x1e75   :  { %v3096_v38 = vsel %vm171_vm2, %v2676_v59, %v3091_v37  ;;  %v3712_v59 = vld [vmem:[%s5086_s7 + $0x48] sm:$0xff] }
0x1e76   :  { %4121 = vmatprep.mubr.msk.f32.mxu0 %vm86_vm0, %v3096_v38  ;;  %v3727_v37 = vld [vmem:[%s5085_s6 + $0xe] ss:$0 sm:$0xff] }
0x1e78   :  { %v3093_v39 = vpop.permute.xlu1 %3092 }
0x1e79   :  { %v3097_v40 = vsel %vm171_vm2, %v4944_v20, %v3093_v39  ;;  %v3713_v20 = vld [vmem:[%s5086_s7 + $0x50] sm:$0xff] }
0x1e7a   :  { %4122 = vmatmul.mubr.msk.f32.vlgmr.msra.gmra.mrb[26].mxu0 %vm86_vm0, %v3097_v40  ;;  %v4265_v5 = vpack.c.bf16 %v3714_v19, %v3713_v20  ;;  %v47_v20 = vld [vmem:[%s5089_s1 + $0x8] sm:$0xff] }
0x1e7b   :  { %4272 = vmatpush3.bf16.msra.mxu0 %v4269_v63 }
0x1e7c   :  { %4274 = vmatprep.subr.bf16.mxu0 %v4273_v1 }
0x1e7f   :  { %4276 = vmatpush3.bf16.msra.mxu0 %v4273_v1  ;;  %v3732_v1 = vld [vmem:[%s5085_s6 + $0x12] ss:$0 sm:$0xff] }
0x1e80   :  { %4278 = vmatprep.subr.bf16.mxu0 %v4277_v3 }
0x1e83   :  { %4280 = vmatpush3.bf16.msra.mxu0 %v4277_v3 }
0x1e84   :  { %4282 = vmatprep.subr.bf16.mxu0 %v4281_v29 }
0x1e87   :  { %4284 = vmatpush3.bf16.msra.mxu0 %v4281_v29 }
0x1f4d   :  { %v4123_v42 = vpop.f32.mrb[26].mxu0 }
0x1f4e   :  { %v3186_v43 = vadd.f32 %v4123_v42, %v3704_v41  ;;  %v3180_v44 = vpop.f32.mrb[27].mxu0 }
0x1f4f   :  { %v3181_v45 = vadd.f32 %v3704_v41, %v3180_v44 }
0x1f50   :  { %v3190_v46 = vadd.f32 %v3186_v43, %v4877_v15 }
0x1f51   :  { %v3189_v47 = vadd.f32 %v3181_v45, %v4875_v18  ;;  %v3711_v18 = vld [vmem:[%s5086_s7 + $0x40] sm:$0xff] }
0x1f52   :  { %v3196_v48 = vsel %vm86_vm0, %v3190_v46, 0.0  ;;  %v4261_v7 = vpack.c.bf16 %v3712_v59, %v3711_v18  ;;  %v3463_v18 = vld [vmem:[%s5090_s10 + $0x10] sm:$0xff]  ;;  %v3464_v59 = vld [vmem:[%s5090_s10 + $0x18] sm:$0xff] }
0x1f53   :  { %3197 = vadd.xlane.f32.xlu1 %v3196_v48  ;;  %v3193_v49 = vsel %vm86_vm0, %v3189_v47, 0.0 }
0x1f54   :  { %3194 = vadd.xlane.f32.xlu0 %v3193_v49  ;;  %4262 = vmatprep.subr.bf16.mxu1 %v4261_v7 }
0x1f55   :  { %4264 = vmatpush3.bf16.msra.mxu1 %v4261_v7  ;;  %v4289_v7 = vpack.c.bf16 %v3464_v59, %v3463_v18 }
0x1f56   :  { %4266 = vmatprep.subr.bf16.mxu1 %v4265_v5 }
0x1f59   :  { %4268 = vmatpush3.bf16.msra.mxu1 %v4265_v5 }
0x1fe0   :  { %v3198_v50 = vpop.xlane.xlu1 %3197 }
0x1fe1   :  { %v3200_v51 = vmul.f32 0.03125, %v3198_v50  ;;  %v3195_v52 = vpop.xlane.xlu0 %3194 }
0x1fe2   :  { %v3199_v53 = vmul.f32 0.03125, %v3195_v52 }
0x1fe3   :  { %v3202_v54 = vsub.f32 %v3190_v46, %v3200_v51 }
0x1fe4   :  { %v3201_v55 = vsub.f32 %v3189_v47, %v3199_v53 }
0x1fe5   :  { %v3204_v58 = vmul.f32 %v3202_v54, %v3202_v54 }
0x1fe6   :  { %v3203_v56 = vmul.f32 %v3201_v55, %v3201_v55 }
0x1fe7   :  { %v3208_v15 = vsel %vm86_vm0, %v3204_v58, 0.0  ;;  %v3462_v58 = vld [vmem:[%s5090_s10 + $0x8] sm:$0xff] }
0x1fe8   :  { %v3205_v57 = vsel %vm86_vm0, %v3203_v56, 0.0  ;;  %v46_v56 = vld [vmem:[%s5089_s1] sm:$0xff] }
0x1fe9   :  { %3206 = vadd.xlane.f32.xlu0 %v3205_v57  ;;  %v3461_v57 = vld [vmem:[%s5090_s10] sm:$0xff] }
0x1fed   :  { %3209 = vadd.xlane.f32.xlu0 %v3208_v15  ;;  %v4285_v15 = vpack.c.bf16 %v3462_v58, %v3461_v57 }
0x1fef   :  { %4286 = vmatprep.subr.bf16.mxu1 %v4285_v15 }
0x2076   :  { %v3207_v4 = vpop.xlane.xlu0 %3206 }
0x2077   :  { %v3211_v6 = vmul.f32 0.03125, %v3207_v4  ;;  %v3733_v4 = vld [vmem:[%s5085_s6 + $0x16] ss:$0 sm:$0xff] }
0x2079   :  { %v3213_v25 = vadd.f32 1e-05, %v3211_v6 }
0x207a   :  { %v3210_v9 = vpop.xlane.xlu0 %3209 }
0x207b   :  { %4369 = vrsqrt.f32 %v3213_v25  ;;  %v3212_v10 = vmul.f32 0.03125, %v3210_v9 }
0x207d   :  { %v3214_v11 = vadd.f32 1e-05, %v3212_v10 }
0x207f   :  { %4371 = vrsqrt.f32 %v3214_v11 }
0x2085   :  { %v4370_v30 = vpop.eup %4369 }
0x2086   :  { %v3217_v13 = vmul.f32 %v4370_v30, %v3201_v55  ;;  %v3734_v30 = vld [vmem:[%s5091_s11] ss:$0 sm:$0xff] }
0x2088   :  { %v3223_v17 = vmul.f32 %v3709_v12, %v3217_v13 }
0x2089   :  { %v4372_v21 = vpop.eup %4371 }
0x208a   :  { %v3218_v23 = vmul.f32 %v4372_v21, %v3202_v54  ;;  %v3229_v26 = vadd.f32 %v3710_v14, %v3223_v17  ;;  %v3737_v21 = vld [vmem:[%s5092_s12] ss:$0 sm:$0xff] }
0x208c   :  { %v3224_v27 = vmul.f32 %v3709_v12, %v3218_v23  ;;  %4132 = vmatprep.mubr.msk.f32.mxu1 %vm86_vm0, %v3229_v26 }
0x208e   :  { %v3230_v28 = vadd.f32 %v3710_v14, %v3224_v27 }
0x2090   :  { %4133 = vmatmul.mubr.msk.f32.vlgmr.msra.gmra.mrb[40].mxu1 %vm86_vm0, %v3230_v28 }
0x2091   :  { %4288 = vmatpush3.bf16.msra.mxu1 %v4285_v15 }
0x2092   :  { %4290 = vmatprep.subr.bf16.mxu1 %v4289_v7 }
0x2095   :  { %4292 = vmatpush3.bf16.msra.mxu1 %v4289_v7 }
0x2163   :  { %v4134_v31 = vpop.f32.mrb[40].mxu1 }
0x2164   :  { %v3319_v32 = vadd.f32 %v4134_v31, %v3715_v22  ;;  %v3313_v33 = vpop.f32.mrb[41].mxu1 }
0x2165   :  { %v3314_v34 = vadd.f32 %v3715_v22, %v3313_v33 }
0x2166   :  { %v3323_v36 = vmax.f32 %v3319_v32, 0.0 }
0x2167   :  { %v3322_v35 = vmax.f32 %v3314_v34, 0.0 }
0x2169   :  { %4151 = vmatprep.mubr.msk.f32.mxu0 %vm1083_vm9, %v3322_v35 }
0x216a   :  { %4152 = vmatmul.mubr.msk.f32.vlgmr.msra.gmra.mrb[28].mxu0 %vm1083_vm9, %v3323_v36 }
0x223d   :  { %v4153_v38 = vpop.f32.mrb[28].mxu0 }
0x223e   :  { %v3416_v39 = vadd.f32 %v4153_v38, %v3727_v37  ;;  %v3410_v40 = vpop.f32.mrb[29].mxu0 }
0x223f   :  { %v3411_v41 = vadd.f32 %v3727_v37, %v3410_v40 }
0x2240   :  { %v3420_v42 = vadd.f32 %v3416_v39, %v3230_v28 }
0x2241   :  { %v3419_v43 = vadd.f32 %v3411_v41, %v3229_v26 }
0x2242   :  { %v3426_v44 = vsel %vm86_vm0, %v3420_v42, 0.0 }
0x2243   :  { %3427 = vadd.xlane.f32.xlu0 %v3426_v44  ;;  %v3423_v45 = vsel %vm86_vm0, %v3419_v43, 0.0 }
0x2244   :  { %3424 = vadd.xlane.f32.xlu1 %v3423_v45 }
0x22d0   :  { %v3428_v46 = vpop.xlane.xlu0 %3427 }
0x22d1   :  { %v3430_v47 = vmul.f32 0.03125, %v3428_v46  ;;  %v3425_v48 = vpop.xlane.xlu1 %3424 }
0x22d2   :  { %v3429_v49 = vmul.f32 0.03125, %v3425_v48 }
0x22d3   :  { %v3432_v50 = vsub.f32 %v3420_v42, %v3430_v47 }
0x22d4   :  { %v3431_v51 = vsub.f32 %v3419_v43, %v3429_v49 }
0x22d5   :  { %v3434_v52 = vmul.f32 %v3432_v50, %v3432_v50 }
0x22d6   :  { %v3433_v53 = vmul.f32 %v3431_v51, %v3431_v51 }
0x22d7   :  { %v3438_v54 = vsel %vm86_vm0, %v3434_v52, 0.0 }
0x22d8   :  { %3439 = vadd.xlane.f32.xlu0 %v3438_v54  ;;  %v3435_v55 = vsel %vm86_vm0, %v3433_v53, 0.0 }
0x22d9   :  { %3436 = vadd.xlane.f32.xlu1 %v3435_v55 }
0x22ea   :  { %3468 = vperm.xlu1 %4303, %v46_v56  }
0x22ee   :  { %3473 = vperm.xlu0 %4304, %v47_v20  }
0x2365   :  { %v3440_v19 = vpop.xlane.xlu0 %3439 }
0x2366   :  { %v3442_v5 = vmul.f32 0.03125, %v3440_v19  ;;  %v3437_v60 = vpop.xlane.xlu1 %3436 }
0x2367   :  { %v3441_v61 = vmul.f32 0.03125, %v3437_v60 }
0x2368   :  { %v3444_v62 = vadd.f32 1e-05, %v3442_v5 }
0x2369   :  { %v3443_v63 = vadd.f32 1e-05, %v3441_v61 }
0x236a   :  { %4373 = vrsqrt.f32 %v3444_v62  ;;  %v3469_v12 = vpop.permute.xlu1 %3468 }
0x236b   :  { %4375 = vrsqrt.f32 %v3443_v63  ;;  %v3482_v14 = vmul.f32 %v3734_v30, %v3469_v12 }
0x236d   :  { %v3474_v11 = vpop.permute.xlu0 %3473 }
0x236e   :  { %v3483_v13 = vmul.f32 %v3734_v30, %v3474_v11 }
0x2374   :  { %v4374_v0 = vpop.eup %4373 }
0x2375   :  { %v4376_v2 = vpop.eup %4375  ;;  %v3448_v8 = vmul.f32 %v4374_v0, %v3432_v50 }
0x2376   :  { %v3447_v3 = vmul.f32 %v4376_v2, %v3431_v51 }
0x2377   :  { %v3454_v6 = vmul.f32 %v3732_v1, %v3448_v8 }
0x2378   :  { %v3453_v25 = vmul.f32 %v3732_v1, %v3447_v3 }
0x2379   :  { %v3460_v10 = vadd.f32 %v3733_v4, %v3454_v6 }
0x237a   :  { %v3459_v9 = vadd.f32 %v3733_v4, %v3453_v25 }
0x237c   :  { %4162 = vmatprep.mubr.msk.f32.mxu1 %vm86_vm0, %v3459_v9 }
0x237d   :  { %4163 = vmatmul.mubr.msk.f32.vlgmr.msra.gmra.mrb[42].mxu1 %vm86_vm0, %v3460_v10 }
0x2450   :  { %v4164_v17 = vpop.f32.mrb[42].mxu1 }
0x2451   :  { %v3562_v23 = vadd.f32 %v4164_v17, %v3483_v13  ;;  %v3556_v26 = vpop.f32.mrb[43].mxu1 }
0x2452   :  { %v3557_v27 = vadd.f32 %v3556_v26, %v3482_v14 }
0x2453   :  { %v3573_v28 = vadd.f32 %v3737_v21, %v3562_v23 }
0x2454   :  { %v3572_v16 = vadd.f32 %v3737_v21, %v3557_v27 }
0x2455   :  { %v3739_v24 = vmul.f32 -1.442695, %v3573_v28 }
0x2456   :  { %v3738_v29 = vmul.f32 -1.442695, %v3572_v16 }
0x2457   :  { %4377 = vpow2.f32 %v3739_v24 }
0x2458   :  { %4379 = vpow2.f32 %v3738_v29 }
0x2461   :  { %v4378_v22 = vpop.eup %4377 }
0x2462   :  { %v4380_v31 = vpop.eup %4379  ;;  %v3581_v32 = vadd.f32 1.0, %v4378_v22 }
0x2463   :  { %v3580_v33 = vadd.f32 1.0, %v4380_v31 }
0x2464   :  { %4381 = vrcp.f32 %v3581_v32 }
0x2465   :  { %4383 = vrcp.f32 %v3580_v33 }
0x246e   :  { %v4382_v34 = vpop.eup %4381 }
0x246f   :  { %v4384_v35 = vpop.eup %4383  ;;  %3588 = vst.msk [vmem:[%s5093_s13 + $0x8] sm:$0xff] %vm3586_vm10, %v4382_v34 }
0x2470   :  { %3587 = vst.msk [vmem:[%s5093_s13] sm:$0xff] %vm3586_vm10, %v4384_v35 }

</bundles_post_ra>
